<compile_context>
chip_gen: v7x
topology: tpu7x:2x2x1
jax: 0.10.0
libtpu: 0.0.40
codegen_flags: <defaults>
</compile_context>

<pallas_src>
import functools
import math

import jax
import jax.numpy as jnp
import numpy as np
from jax import lax
from jax.experimental import pallas as pl
from jax.experimental.pallas import tpu as pltpu


# ----------------------------- tiling helpers ---------------------------------

def _pick_tile(dim, candidates):
    """Largest candidate tile that evenly divides `dim`; fall back to full dim."""
    for c in candidates:
        if c <= dim and dim % c == 0:
            return c
    return dim


def _split_for_megacore(dim, tile):
    """Prefer >= 2 blocks on a 'parallel' grid axis so both v7x TensorCores work."""
    if tile == dim and dim % 16 == 0:
        return dim // 2
    return tile


def _vmem_limit(total_block_bytes):
    """Double-buffered pipeline blocks + headroom, clamped for v5e..v7x."""
    return int(min(100 * 2 ** 20, max(8 * 2 ** 20, 3 * total_block_bytes)))


# ----------------------------- Pallas kernels ---------------------------------

def _attn_block_kernel(x_ref, xc_ref, wq_ref, bq_ref, wk_ref, bk_ref,
                       wv_ref, bv_ref, wo_ref, bo_ref, g_ref, beta_ref,
                       o_ref, k_sc, v_sc, *, nhead, scale, eps):
    """Fused: Q/K/V proj + multi-head softmax attention + out_proj + residual + LN.

    Grid: (B, Lq//tq).  K/V projections are computed once per batch element
    (qi == 0) into bf16 VMEM scratch and reused across query tiles.
    """
    qi = pl.program_id(1)

    @pl.when(qi == 0)
    def _():
        xc = xc_ref[0].astype(jnp.bfloat16)                       # (Lk, D)
        k = jnp.dot(xc, wk_ref[...], preferred_element_type=jnp.float32) + bk_ref[...]
        v = jnp.dot(xc, wv_ref[...], preferred_element_type=jnp.float32) + bv_ref[...]
        k_sc[...] = k.astype(k_sc.dtype)
        v_sc[...] = v.astype(v_sc.dtype)

    x_f = x_ref[0]                                                # (tq, D) f32
    x_bf = x_f.astype(jnp.bfloat16)
    q = (jnp.dot(x_bf, wq_ref[...], preferred_element_type=jnp.float32)
         + bq_ref[...])                                           # (tq, D) f32
    q_bf = q.astype(jnp.bfloat16)

    k = k_sc[...]                                                 # (Lk, D) bf16
    v = v_sc[...]                                                 # (Lk, D) bf16

    tq, D = q.shape
    dh = D // nhead
    col = lax.broadcasted_iota(jnp.int32, (1, D), 1)
    zq = jnp.zeros_like(q_bf)
    zv = jnp.zeros_like(v)

    o = jnp.zeros((tq, D), jnp.float32)
    for h in range(nhead):                                        # static, unrolled
        sel = (col >= h * dh) & (col < (h + 1) * dh)              # (1, D)
        q_h = jnp.where(sel, q_bf, zq)                            # head-h cols only
        # masked full-D contraction == per-head Dh contraction (other cols are 0)
        s = lax.dot_general(q_h, k, (((1,), (1,)), ((), ())),
                            preferred_element_type=jnp.float32) * scale   # (tq, Lk)
        m = jnp.max(s, axis=-1, keepdims=True)
        p = jnp.exp(s - m)
        l = jnp.sum(p, axis=-1, keepdims=True)
        p = p * pl.reciprocal(l, approx=True)
        v_h = jnp.where(sel, v, zv)                               # head-h output cols
        o = o + jnp.dot(p.astype(jnp.bfloat16), v_h,
                        preferred_element_type=jnp.float32)

    # out_proj + bias + residual(x) + LayerNorm.
    y = (jnp.dot(o.astype(jnp.bfloat16), wo_ref[...],
                 preferred_element_type=jnp.float32)
         + bo_ref[...] + x_f)
    mu = jnp.mean(y, axis=-1, keepdims=True)
    yc = y - mu
    var = jnp.mean(yc * yc, axis=-1, keepdims=True)
    inv = lax.rsqrt(var + eps)
    o_ref[0] = (yc * inv * g_ref[...] + beta_ref[...]).astype(o_ref.dtype)


def _ffn_block_kernel(y_ref, w1_ref, b1_ref, w2_ref, b2_ref, g_ref, beta_ref,
                      o_ref, acc_ref, *, eps):
    """Fused FFN: out = LN(y + relu(y@W1 + b1)@W2 + b2).

    Grid: (M//tm, F//tf) with the hidden (F) axis as the reduction; the [tm, tf]
    hidden tile never leaves VMEM.
    """
    j = pl.program_id(1)

    @pl.when(j == 0)
    def _():
        acc_ref[...] = jnp.zeros_like(acc_ref)

    y_bf = y_ref[...].astype(jnp.bfloat16)
    h = jnp.dot(y_bf, w1_ref[...], preferred_element_type=jnp.float32) + b1_ref[...]
    h = jnp.maximum(h, 0.0)
    acc_ref[...] += jnp.dot(h.astype(jnp.bfloat16), w2_ref[...],
                            preferred_element_type=jnp.float32)

    @pl.when(j == pl.num_programs(1) - 1)
    def _():
        z = acc_ref[...] + b2_ref[...] + y_ref[...]
        mu = jnp.mean(z, axis=-1, keepdims=True)
        zc = z - mu
        var = jnp.mean(zc * zc, axis=-1, keepdims=True)
        inv = lax.rsqrt(var + eps)
        o_ref[...] = (zc * inv * g_ref[...] + beta_ref[...]).astype(o_ref.dtype)


# ------------------------------ wrappers ---------------------------------------

def attention_block(x, x_cross, wq, bq, wk, bk, wv, bv, wo, bo, gamma, beta,
                    *, nhead, eps):
    B, Lq, D = x.shape
    Lk = x_cross.shape[1]
    tq = _pick_tile(Lq, (512, 256, 128))
    grid = (B, Lq // tq)
    dh = D // nhead

    blk_bytes = (tq * D * 4 + Lk * D * 4          # x, x_cross blocks (f32)
                 + 4 * D * D * 2                  # Wq/Wk/Wv/Wo (bf16)
                 + 6 * D * 4                      # biases, gamma, beta
                 + tq * D * 4                     # output block
                 + 2 * Lk * D * 2)                # K/V scratch (bf16)
    flops = int(2 * B * Lq * D * D                        # Q proj
                + 4 * B * grid[1] * Lk * D * D            # K/V proj (per q-tile)
                + 4 * B * nhead * Lq * Lk * D             # scores + PV (masked)
                + 2 * B * Lq * D * D)                     # out proj
    bytes_accessed = int((B * Lq * D + B * Lk * D) * 4 + 4 * D * D * 2
                         + 6 * D * 4 + B * Lq * D * 4)

    return pl.pallas_call(
        functools.partial(_attn_block_kernel, nhead=nhead,
                          scale=1.0 / math.sqrt(dh), eps=eps),
        out_shape=jax.ShapeDtypeStruct((B, Lq, D), jnp.float32),
        grid=grid,
        in_specs=[
            pl.BlockSpec((1, tq, D), lambda b, q: (b, q, 0)),   # x (also residual)
            pl.BlockSpec((1, Lk, D), lambda b, q: (b, 0, 0)),   # x_cross
            pl.BlockSpec((D, D), lambda b, q: (0, 0)),          # Wq^T
            pl.BlockSpec((1, D), lambda b, q: (0, 0)),          # bq
            pl.BlockSpec((D, D), lambda b, q: (0, 0)),          # Wk^T
            pl.BlockSpec((1, D), lambda b, q: (0, 0)),          # bk
            pl.BlockSpec((D, D), lambda b, q: (0, 0)),          # Wv^T
            pl.BlockSpec((1, D), lambda b, q: (0, 0)),          # bv
            pl.BlockSpec((D, D), lambda b, q: (0, 0)),          # Wo^T
            pl.BlockSpec((1, D), lambda b, q: (0, 0)),          # bo
            pl.BlockSpec((1, D), lambda b, q: (0, 0)),          # gamma
            pl.BlockSpec((1, D), lambda b, q: (0, 0)),          # beta
        ],
        out_specs=pl.BlockSpec((1, tq, D), lambda b, q: (b, q, 0)),
        scratch_shapes=[pltpu.VMEM((Lk, D), jnp.bfloat16),
                        pltpu.VMEM((Lk, D), jnp.bfloat16)],
        compiler_params=pltpu.CompilerParams(
            dimension_semantics=("parallel", "arbitrary"),
            vmem_limit_bytes=_vmem_limit(blk_bytes)),
        cost_estimate=pl.CostEstimate(flops=flops,
                                      transcendentals=int(B * nhead * Lq * Lk),
                                      bytes_accessed=bytes_accessed),
    )(x, x_cross, wq, bq, wk, bk, wv, bv, wo, bo, gamma, beta)


def ffn_block(y, w1, b1, w2, b2, gamma, beta, *, eps):
    M, D = y.shape
    F = w1.shape[1]
    tm = _split_for_megacore(M, _pick_tile(M, (256, 128)))
    tf = _pick_tile(F, (512, 256, 128))
    grid = (M // tm, F // tf)

    blk_bytes = (tm * D * 4 + D * tf * 2 + tf * 4 + tf * D * 2
                 + 3 * D * 4 + 2 * tm * D * 4)
    flops = int(4 * M * D * F)
    bytes_accessed = int(2 * M * D * 4 + D * F * 2 + F * D * 2 + F * 4 + 3 * D * 4)

    return pl.pallas_call(
        functools.partial(_ffn_block_kernel, eps=eps),
        out_shape=jax.ShapeDtypeStruct((M, D), jnp.float32),
        grid=grid,
        in_specs=[
            pl.BlockSpec((tm, D), lambda i, j: (i, 0)),   # y (also residual)
            pl.BlockSpec((D, tf), lambda i, j: (0, j)),   # W1^T
            pl.BlockSpec((1, tf), lambda i, j: (0, j)),   # b1
            pl.BlockSpec((tf, D), lambda i, j: (j, 0)),   # W2^T
            pl.BlockSpec((1, D), lambda i, j: (0, 0)),    # b2
            pl.BlockSpec((1, D), lambda i, j: (0, 0)),    # gamma
            pl.BlockSpec((1, D), lambda i, j: (0, 0)),    # beta
        ],
        out_specs=pl.BlockSpec((tm, D), lambda i, j: (i, 0)),
        scratch_shapes=[pltpu.VMEM((tm, D), jnp.float32)],
        compiler_params=pltpu.CompilerParams(
            dimension_semantics=("parallel", "arbitrary"),
            vmem_limit_bytes=_vmem_limit(blk_bytes)),
        cost_estimate=pl.CostEstimate(flops=flops, transcendentals=0,
                                      bytes_accessed=bytes_accessed),
    )(y, w1, b1, w2, b2, gamma, beta)


# --------------------------- module forward ------------------------------------

def cross_attention_encoder_layer(x, x_cross, params, *, nhead, eps=1e-5):
    B, Lq, D = x.shape

    Wq, Wk, Wv = jnp.split(params["in_proj_w"], 3, axis=0)   # PyTorch [out, in]
    bq, bk, bv = jnp.split(params["in_proj_b"], 3, axis=0)

    bf = jnp.bfloat16
    row = lambda v: v.reshape(1, -1).astype(jnp.float32)

    # Fused: Q/K/V proj + attention + out_proj + residual + LayerNorm.
    y1 = attention_block(
        x, x_cross,
        Wq.T.astype(bf), row(bq),
        Wk.T.astype(bf), row(bk),
        Wv.T.astype(bf), row(bv),
        params["out_proj_w"].T.astype(bf), row(params["out_proj_b"]),
        row(params["ln_g"]), row(params["ln_b"]),
        nhead=nhead, eps=eps)                                  # [B, Lq, D] f32

    # Fused: Linear(4D) + ReLU + Linear(D) + residual + LayerNorm.
    out = ffn_block(
        y1.reshape(B * Lq, D),
        params["ff1_w"].T.astype(bf), row(params["ff1_b"]),
        params["ff2_w"].T.astype(bf), row(params["ff2_b"]),
        row(params["ln_g"]), row(params["ln_b"]), eps=eps)     # [B*Lq, D]
    return out.reshape(B, Lq, D)


# ------------------------------ reference ---------------------------------------

def reference_forward(x, x_cross, params, *, nhead, eps=1e-5):
    D = x.shape[-1]
    Dh = D // nhead
    B, Lq, _ = x.shape
    Lk = x_cross.shape[1]
    Wq, Wk, Wv = jnp.split(params["in_proj_w"], 3, axis=0)
    bq, bk, bv = jnp.split(params["in_proj_b"], 3, axis=0)
    q = x @ Wq.T + bq
    k = x_cross @ Wk.T + bk
    v = x_cross @ Wv.T + bv
    qh = q.reshape(B, Lq, nhead, Dh).transpose(0, 2, 1, 3)
    kh = k.reshape(B, Lk, nhead, Dh).transpose(0, 2, 1, 3)
    vh = v.reshape(B, Lk, nhead, Dh).transpose(0, 2, 1, 3)
    s = jnp.einsum("bhqd,bhkd->bhqk", qh, kh) / jnp.sqrt(jnp.float32(Dh))
    p = jax.nn.softmax(s, axis=-1)
    o = jnp.einsum("bhqk,bhkd->bhqd", p, vh)
    o = o.transpose(0, 2, 1, 3).reshape(B, Lq, D)
    attn_out = o @ params["out_proj_w"].T + params["out_proj_b"]

    def ln(z):
        mu = z.mean(-1, keepdims=True)
        var = ((z - mu) ** 2).mean(-1, keepdims=True)
        return (z - mu) / jnp.sqrt(var + eps) * params["ln_g"] + params["ln_b"]

    y1 = ln(x + attn_out)
    ff = jnp.maximum(y1 @ params["ff1_w"].T + params["ff1_b"], 0.0) @ params["ff2_w"].T \
        + params["ff2_b"]
    return ln(y1 + ff)


# --------------------------------- main ------------------------------------------

if __name__ == "__main__":
    B, Lq, Lkv = 2, 8, 8
    D, H = 32, 4

    key = jax.random.PRNGKey(0)
    ks = jax.random.split(key, 12)
    params = {
        "in_proj_w": jax.random.normal(ks[0], (3 * D, D), jnp.float32) * 0.1,
        "in_proj_b": jax.random.normal(ks[1], (3 * D,), jnp.float32) * 0.1,
        "out_proj_w": jax.random.normal(ks[2], (D, D), jnp.float32) * 0.1,
        "out_proj_b": jax.random.normal(ks[3], (D,), jnp.float32) * 0.1,
        "ln_g": jax.random.uniform(ks[4], (D,), jnp.float32, 0.5, 1.5),
        "ln_b": jax.random.normal(ks[5], (D,), jnp.float32) * 0.1,
        "ff1_w": jax.random.normal(ks[6], (4 * D, D), jnp.float32) * 0.1,
        "ff1_b": jax.random.normal(ks[7], (4 * D,), jnp.float32) * 0.1,
        "ff2_w": jax.random.normal(ks[8], (D, 4 * D), jnp.float32) * 0.1,
        "ff2_b": jax.random.normal(ks[9], (D,), jnp.float32) * 0.1,
    }
    x = jax.random.normal(ks[10], (B, Lq, D), jnp.float32)
    x_cross = jax.random.normal(ks[11], (B, Lkv, D), jnp.float32)

    fwd = jax.jit(functools.partial(cross_attention_encoder_layer, nhead=H))
    out = jax.block_until_ready(fwd(x, x_cross, params))
    ref = jax.block_until_ready(reference_forward(x, x_cross, params, nhead=H))

    # bf16 MXU operands with f32 accumulation -> looser tolerance than pure f32.
    np.testing.assert_allclose(np.asarray(out), np.asarray(ref), rtol=5e-2, atol=5e-2)
    print("KERNEL_OK")
</pallas_src>

<mosaic_0001>
module attributes {stable_mosaic.version = 11 : i64} {
  func.func @_ffn_block_kernel(%arg0: i32, %arg1: i32, %arg2: memref<8x32xf32, #tpu.memory_space<vmem>>, %arg3: memref<32x128xbf16, #tpu.memory_space<vmem>>, %arg4: memref<1x128xf32, #tpu.memory_space<vmem>>, %arg5: memref<128x32xbf16, #tpu.memory_space<vmem>>, %arg6: memref<1x32xf32, #tpu.memory_space<vmem>>, %arg7: memref<1x32xf32, #tpu.memory_space<vmem>>, %arg8: memref<1x32xf32, #tpu.memory_space<vmem>>, %arg9: memref<8x32xf32, #tpu.memory_space<vmem>>, %arg10: memref<8x32xf32, #tpu.memory_space<vmem>>) attributes {dimension_semantics = [#tpu.dimension_semantics<parallel>, #tpu.dimension_semantics<arbitrary>], iteration_bounds = array<i64: 2, 1>, scalar_prefetch = 0 : i64, scratch_operands = 1 : i64, tpu.core_type = #tpu.core_type<tc>, window_params = [{transform_indices = @transform_0, window_bounds = array<i64: 8, 32>}, {transform_indices = @transform_1, window_bounds = array<i64: 32, 128>}, {transform_indices = @transform_2, window_bounds = array<i64: 1, 128>}, {transform_indices = @transform_3, window_bounds = array<i64: 128, 32>}, {pipeline_mode = #tpu.pipeline_mode<synchronous>, transform_indices = @transform_4, window_bounds = array<i64: 1, 32>}, {pipeline_mode = #tpu.pipeline_mode<synchronous>, transform_indices = @transform_5, window_bounds = array<i64: 1, 32>}, {pipeline_mode = #tpu.pipeline_mode<synchronous>, transform_indices = @transform_6, window_bounds = array<i64: 1, 32>}, {transform_indices = @transform_7, window_bounds = array<i64: 8, 32>}]} {
    %c0_i32 = arith.constant 0 : i32
    %0 = arith.cmpi eq, %arg1, %c0_i32 : i32
    %1 = arith.extui %0 : i1 to i32
    %c0_i32_0 = arith.constant 0 : i32
    %2 = arith.cmpi ne, %1, %c0_i32_0 : i32
    scf.if %2 {
      %cst_16 = arith.constant 0.000000e+00 : f32
      %21 = vector.broadcast %cst_16 : f32 to vector<8x32xf32>
      %c0_17 = arith.constant 0 : index
      %c0_18 = arith.constant 0 : index
      %22 = vector.load %arg10[%c0_17, %c0_18] : memref<8x32xf32, #tpu.memory_space<vmem>>, vector<8x32xf32>
      tpu.vector_store %arg10[%c0_17, %c0_18], %21 {strides = array<i32>} : memref<8x32xf32, #tpu.memory_space<vmem>>, vector<8x32xf32>,
    } else {
    }
    %c0 = arith.constant 0 : index
    %c0_1 = arith.constant 0 : index
    %3 = vector.load %arg2[%c0, %c0_1] : memref<8x32xf32, #tpu.memory_space<vmem>>, vector<8x32xf32>
    %4 = arith.truncf %3 : vector<8x32xf32> to vector<8x32xbf16>
    %c0_2 = arith.constant 0 : index
    %c0_3 = arith.constant 0 : index
    %5 = vector.load %arg3[%c0_2, %c0_3] : memref<32x128xbf16, #tpu.memory_space<vmem>>, vector<32x128xbf16>
    %cst = arith.constant dense<0.000000e+00> : vector<8x128xf32>
    %6 = tpu.matmul %4, %5, %cst {dimension_numbers = #tpu.dot_dimension_numbers<[1], [0], [0], [1], [0, 0, 1, 1], [], []>} : vector<8x32xbf16>, vector<32x128xbf16>, vector<8x128xf32> -> vector<8x128xf32>
    %c0_4 = arith.constant 0 : index
    %c0_5 = arith.constant 0 : index
    %7 = vector.load %arg4[%c0_4, %c0_5] : memref<1x128xf32, #tpu.memory_space<vmem>>, vector<1x128xf32>
    %8 = vector.broadcast %7 : vector<1x128xf32> to vector<8x128xf32>
    %9 = arith.addf %6, %8 : vector<8x128xf32>
    %cst_6 = arith.constant 0.000000e+00 : f32
    %10 = vector.broadcast %cst_6 : f32 to vector<8x128xf32>
    %11 = arith.maximumf %9, %10 : vector<8x128xf32>
    %c0_7 = arith.constant 0 : index
    %c0_8 = arith.constant 0 : index
    %12 = vector.load %arg10[%c0_7, %c0_8] : memref<8x32xf32, #tpu.memory_space<vmem>>, vector<8x32xf32>
    %13 = arith.truncf %11 : vector<8x128xf32> to vector<8x128xbf16>
    %c0_9 = arith.constant 0 : index
    %c0_10 = arith.constant 0 : index
    %14 = vector.load %arg5[%c0_9, %c0_10] : memref<128x32xbf16, #tpu.memory_space<vmem>>, vector<128x32xbf16>
    %cst_11 = arith.constant dense<0.000000e+00> : vector<8x32xf32>
    %15 = tpu.matmul %13, %14, %cst_11 {dimension_numbers = #tpu.dot_dimension_numbers<[1], [0], [0], [1], [0, 0, 1, 1], [], []>} : vector<8x128xbf16>, vector<128x32xbf16>, vector<8x32xf32> -> vector<8x32xf32>
    %16 = arith.addf %12, %15 : vector<8x32xf32>
    %c0_12 = arith.constant 0 : index
    %c0_13 = arith.constant 0 : index
    %17 = vector.load %arg10[%c0_12, %c0_13] : memref<8x32xf32, #tpu.memory_space<vmem>>, vector<8x32xf32>
    tpu.vector_store %arg10[%c0_12, %c0_13], %16 {strides = array<i32>} : memref<8x32xf32, #tpu.memory_space<vmem>>, vector<8x32xf32>,
    %c0_i32_14 = arith.constant 0 : i32
    %18 = arith.cmpi eq, %arg1, %c0_i32_14 : i32
    %19 = arith.extui %18 : i1 to i32
    %c0_i32_15 = arith.constant 0 : i32
    %20 = arith.cmpi ne, %19, %c0_i32_15 : i32
    scf.if %20 {
      %c0_16 = arith.constant 0 : index
      %c0_17 = arith.constant 0 : index
      %21 = vector.load %arg10[%c0_16, %c0_17] : memref<8x32xf32, #tpu.memory_space<vmem>>, vector<8x32xf32>
      %c0_18 = arith.constant 0 : index
      %c0_19 = arith.constant 0 : index
      %22 = vector.load %arg6[%c0_18, %c0_19] : memref<1x32xf32, #tpu.memory_space<vmem>>, vector<1x32xf32>
      %23 = vector.broadcast %22 : vector<1x32xf32> to vector<8x32xf32>
      %24 = arith.addf %21, %23 : vector<8x32xf32>
      %c0_20 = arith.constant 0 : index
      %c0_21 = arith.constant 0 : index
      %25 = vector.load %arg2[%c0_20, %c0_21] : memref<8x32xf32, #tpu.memory_space<vmem>>, vector<8x32xf32>
      %26 = arith.addf %24, %25 : vector<8x32xf32>
      %cst_22 = arith.constant dense<0.000000e+00> : vector<8xf32>
      %27 = vector.multi_reduction <add>, %26, %cst_22 [1] : vector<8x32xf32> to vector<8xf32>
      %28 = vector.shape_cast %27 : vector<8xf32> to vector<8x1xf32>
      %cst_23 = arith.constant 3.200000e+01 : f32
      %29 = vector.broadcast %cst_23 : f32 to vector<8x1xf32>
      %30 = arith.divf %28, %29 : vector<8x1xf32>
      %31 = vector.broadcast %30 : vector<8x1xf32> to vector<8x32xf32>
      %32 = arith.subf %26, %31 : vector<8x32xf32>
      %33 = arith.mulf %32, %32 : vector<8x32xf32>
      %cst_24 = arith.constant dense<0.000000e+00> : vector<8xf32>
      %34 = vector.multi_reduction <add>, %33, %cst_24 [1] : vector<8x32xf32> to vector<8xf32>
      %35 = vector.shape_cast %34 : vector<8xf32> to vector<8x1xf32>
      %cst_25 = arith.constant 3.200000e+01 : f32
      %36 = vector.broadcast %cst_25 : f32 to vector<8x1xf32>
      %37 = arith.divf %35, %36 : vector<8x1xf32>
      %cst_26 = arith.constant 9.99999974E-6 : f32
      %38 = vector.broadcast %cst_26 : f32 to vector<8x1xf32>
      %39 = arith.addf %37, %38 : vector<8x1xf32>
      %40 = math.rsqrt %39 : vector<8x1xf32>
      %41 = vector.broadcast %40 : vector<8x1xf32> to vector<8x32xf32>
      %42 = arith.mulf %32, %41 : vector<8x32xf32>
      %c0_27 = arith.constant 0 : index
      %c0_28 = arith.constant 0 : index
      %43 = vector.load %arg7[%c0_27, %c0_28] : memref<1x32xf32, #tpu.memory_space<vmem>>, vector<1x32xf32>
      %44 = vector.broadcast %43 : vector<1x32xf32> to vector<8x32xf32>
      %45 = arith.mulf %42, %44 : vector<8x32xf32>
      %c0_29 = arith.constant 0 : index
      %c0_30 = arith.constant 0 : index
      %46 = vector.load %arg8[%c0_29, %c0_30] : memref<1x32xf32, #tpu.memory_space<vmem>>, vector<1x32xf32>
      %47 = vector.broadcast %46 : vector<1x32xf32> to vector<8x32xf32>
      %48 = arith.addf %45, %47 : vector<8x32xf32>
      %c0_31 = arith.constant 0 : index
      %c0_32 = arith.constant 0 : index
      %49 = vector.load %arg9[%c0_31, %c0_32] : memref<8x32xf32, #tpu.memory_space<vmem>>, vector<8x32xf32>
      tpu.vector_store %arg9[%c0_31, %c0_32], %48 {strides = array<i32>} : memref<8x32xf32, #tpu.memory_space<vmem>>, vector<8x32xf32>,
    } else {
    }
    return
  }
  func.func @transform_0(%arg0: i32, %arg1: i32) -> (i32, i32) {
    %c0_i32 = arith.constant 0 : i32
    %c0_i32_0 = arith.constant 0 : i32
    return %arg0, %c0_i32 : i32, i32
  }
  func.func @transform_1(%arg0: i32, %arg1: i32) -> (i32, i32) {
    %c0_i32 = arith.constant 0 : i32
    %c0_i32_0 = arith.constant 0 : i32
    return %c0_i32, %arg1 : i32, i32
  }
  func.func @transform_2(%arg0: i32, %arg1: i32) -> (i32, i32) {
    %c0_i32 = arith.constant 0 : i32
    %c0_i32_0 = arith.constant 0 : i32
    return %c0_i32, %arg1 : i32, i32
  }
  func.func @transform_3(%arg0: i32, %arg1: i32) -> (i32, i32) {
    %c0_i32 = arith.constant 0 : i32
    %c0_i32_0 = arith.constant 0 : i32
    return %arg1, %c0_i32 : i32, i32
  }
  func.func @transform_4(%arg0: i32, %arg1: i32) -> (i32, i32) {
    %c0_i32 = arith.constant 0 : i32
    %c0_i32_0 = arith.constant 0 : i32
    %c0_i32_1 = arith.constant 0 : i32
    return %c0_i32, %c0_i32_0 : i32, i32
  }
  func.func @transform_5(%arg0: i32, %arg1: i32) -> (i32, i32) {
    %c0_i32 = arith.constant 0 : i32
    %c0_i32_0 = arith.constant 0 : i32
    %c0_i32_1 = arith.constant 0 : i32
    return %c0_i32, %c0_i32_0 : i32, i32
  }
  func.func @transform_6(%arg0: i32, %arg1: i32) -> (i32, i32) {
    %c0_i32 = arith.constant 0 : i32
    %c0_i32_0 = arith.constant 0 : i32
    %c0_i32_1 = arith.constant 0 : i32
    return %c0_i32, %c0_i32_0 : i32, i32
  }
  func.func @transform_7(%arg0: i32, %arg1: i32) -> (i32, i32) {
    %c0_i32 = arith.constant 0 : i32
    %c0_i32_0 = arith.constant 0 : i32
    return %arg0, %c0_i32 : i32, i32
  }
}

module attributes {stable_mosaic.version = 11 : i64} {
  func.func @_attn_block_kernel(%arg0: i32, %arg1: i32, %arg2: memref<1x8x32xf32, #tpu.memory_space<vmem>>, %arg3: memref<1x8x32xf32, #tpu.memory_space<vmem>>, %arg4: memref<32x32xbf16, #tpu.memory_space<vmem>>, %arg5: memref<1x32xf32, #tpu.memory_space<vmem>>, %arg6: memref<32x32xbf16, #tpu.memory_space<vmem>>, %arg7: memref<1x32xf32, #tpu.memory_space<vmem>>, %arg8: memref<32x32xbf16, #tpu.memory_space<vmem>>, %arg9: memref<1x32xf32, #tpu.memory_space<vmem>>, %arg10: memref<32x32xbf16, #tpu.memory_space<vmem>>, %arg11: memref<1x32xf32, #tpu.memory_space<vmem>>, %arg12: memref<1x32xf32, #tpu.memory_space<vmem>>, %arg13: memref<1x32xf32, #tpu.memory_space<vmem>>, %arg14: memref<1x8x32xf32, #tpu.memory_space<vmem>>, %arg15: memref<8x32xbf16, #tpu.memory_space<vmem>>, %arg16: memref<8x32xbf16, #tpu.memory_space<vmem>>) attributes {dimension_semantics = [#tpu.dimension_semantics<parallel>, #tpu.dimension_semantics<arbitrary>], iteration_bounds = array<i64: 2, 1>, scalar_prefetch = 0 : i64, scratch_operands = 2 : i64, tpu.core_type = #tpu.core_type<tc>, window_params = [{transform_indices = @transform_0, window_bounds = array<i64: 1, 8, 32>}, {transform_indices = @transform_1, window_bounds = array<i64: 1, 8, 32>}, {pipeline_mode = #tpu.pipeline_mode<synchronous>, transform_indices = @transform_2, window_bounds = array<i64: 32, 32>}, {pipeline_mode = #tpu.pipeline_mode<synchronous>, transform_indices = @transform_3, window_bounds = array<i64: 1, 32>}, {pipeline_mode = #tpu.pipeline_mode<synchronous>, transform_indices = @transform_4, window_bounds = array<i64: 32, 32>}, {pipeline_mode = #tpu.pipeline_mode<synchronous>, transform_indices = @transform_5, window_bounds = array<i64: 1, 32>}, {pipeline_mode = #tpu.pipeline_mode<synchronous>, transform_indices = @transform_6, window_bounds = array<i64: 32, 32>}, {pipeline_mode = #tpu.pipeline_mode<synchronous>, transform_indices = @transform_7, window_bounds = array<i64: 1, 32>}, {pipeline_mode = #tpu.pipeline_mode<synchronous>, transform_indices = @transform_8, window_bounds = array<i64: 32, 32>}, {pipeline_mode = #tpu.pipeline_mode<synchronous>, transform_indices = @transform_9, window_bounds = array<i64: 1, 32>}, {pipeline_mode = #tpu.pipeline_mode<synchronous>, transform_indices = @transform_10, window_bounds = array<i64: 1, 32>}, {pipeline_mode = #tpu.pipeline_mode<synchronous>, transform_indices = @transform_11, window_bounds = array<i64: 1, 32>}, {transform_indices = @transform_12, window_bounds = array<i64: 1, 8, 32>}]} {
    %c0_i32 = arith.constant 0 : i32
    %0 = arith.cmpi eq, %arg1, %c0_i32 : i32
    %1 = arith.extui %0 : i1 to i32
    %c0_i32_0 = arith.constant 0 : i32
    %2 = arith.cmpi ne, %1, %c0_i32_0 : i32
    scf.if %2 {
      %c0_55 = arith.constant 0 : index
      %c0_56 = arith.constant 0 : index
      %c0_57 = arith.constant 0 : index
      %158 = vector.load %arg3[%c0_55, %c0_56, %c0_57] : memref<1x8x32xf32, #tpu.memory_space<vmem>>, vector<1x8x32xf32>
      %159 = vector.shape_cast %158 : vector<1x8x32xf32> to vector<8x32xf32>
      %160 = arith.truncf %159 : vector<8x32xf32> to vector<8x32xbf16>
      %c0_58 = arith.constant 0 : index
      %c0_59 = arith.constant 0 : index
      %161 = vector.load %arg6[%c0_58, %c0_59] : memref<32x32xbf16, #tpu.memory_space<vmem>>, vector<32x32xbf16>
      %cst_60 = arith.constant dense<0.000000e+00> : vector<8x32xf32>
      %162 = tpu.matmul %160, %161, %cst_60 {dimension_numbers = #tpu.dot_dimension_numbers<[1], [0], [0], [1], [0, 0, 1, 1], [], []>} : vector<8x32xbf16>, vector<32x32xbf16>, vector<8x32xf32> -> vector<8x32xf32>
      %c0_61 = arith.constant 0 : index
      %c0_62 = arith.constant 0 : index
      %163 = vector.load %arg7[%c0_61, %c0_62] : memref<1x32xf32, #tpu.memory_space<vmem>>, vector<1x32xf32>
      %164 = vector.broadcast %163 : vector<1x32xf32> to vector<8x32xf32>
      %165 = arith.addf %162, %164 : vector<8x32xf32>
      %c0_63 = arith.constant 0 : index
      %c0_64 = arith.constant 0 : index
      %166 = vector.load %arg8[%c0_63, %c0_64] : memref<32x32xbf16, #tpu.memory_space<vmem>>, vector<32x32xbf16>
      %cst_65 = arith.constant dense<0.000000e+00> : vector<8x32xf32>
      %167 = tpu.matmul %160, %166, %cst_65 {dimension_numbers = #tpu.dot_dimension_numbers<[1], [0], [0], [1], [0, 0, 1, 1], [], []>} : vector<8x32xbf16>, vector<32x32xbf16>, vector<8x32xf32> -> vector<8x32xf32>
      %c0_66 = arith.constant 0 : index
      %c0_67 = arith.constant 0 : index
      %168 = vector.load %arg9[%c0_66, %c0_67] : memref<1x32xf32, #tpu.memory_space<vmem>>, vector<1x32xf32>
      %169 = vector.broadcast %168 : vector<1x32xf32> to vector<8x32xf32>
      %170 = arith.addf %167, %169 : vector<8x32xf32>
      %171 = arith.truncf %165 : vector<8x32xf32> to vector<8x32xbf16>
      %c0_68 = arith.constant 0 : index
      %c0_69 = arith.constant 0 : index
      %172 = vector.load %arg15[%c0_68, %c0_69] : memref<8x32xbf16, #tpu.memory_space<vmem>>, vector<8x32xbf16>
      tpu.vector_store %arg15[%c0_68, %c0_69], %171 {strides = array<i32>} : memref<8x32xbf16, #tpu.memory_space<vmem>>, vector<8x32xbf16>,
      %173 = arith.truncf %170 : vector<8x32xf32> to vector<8x32xbf16>
      %c0_70 = arith.constant 0 : index
      %c0_71 = arith.constant 0 : index
      %174 = vector.load %arg16[%c0_70, %c0_71] : memref<8x32xbf16, #tpu.memory_space<vmem>>, vector<8x32xbf16>
      tpu.vector_store %arg16[%c0_70, %c0_71], %173 {strides = array<i32>} : memref<8x32xbf16, #tpu.memory_space<vmem>>, vector<8x32xbf16>,
    } else {
    }
    %c0 = arith.constant 0 : index
    %c0_1 = arith.constant 0 : index
    %c0_2 = arith.constant 0 : index
    %3 = vector.load %arg2[%c0, %c0_1, %c0_2] : memref<1x8x32xf32, #tpu.memory_space<vmem>>, vector<1x8x32xf32>
    %4 = vector.shape_cast %3 : vector<1x8x32xf32> to vector<8x32xf32>
    %5 = arith.truncf %4 : vector<8x32xf32> to vector<8x32xbf16>
    %c0_3 = arith.constant 0 : index
    %c0_4 = arith.constant 0 : index
    %6 = vector.load %arg4[%c0_3, %c0_4] : memref<32x32xbf16, #tpu.memory_space<vmem>>, vector<32x32xbf16>
    %cst = arith.constant dense<0.000000e+00> : vector<8x32xf32>
    %7 = tpu.matmul %5, %6, %cst {dimension_numbers = #tpu.dot_dimension_numbers<[1], [0], [0], [1], [0, 0, 1, 1], [], []>} : vector<8x32xbf16>, vector<32x32xbf16>, vector<8x32xf32> -> vector<8x32xf32>
    %c0_5 = arith.constant 0 : index
    %c0_6 = arith.constant 0 : index
    %8 = vector.load %arg5[%c0_5, %c0_6] : memref<1x32xf32, #tpu.memory_space<vmem>>, vector<1x32xf32>
    %9 = vector.broadcast %8 : vector<1x32xf32> to vector<8x32xf32>
    %10 = arith.addf %7, %9 : vector<8x32xf32>
    %11 = arith.truncf %10 : vector<8x32xf32> to vector<8x32xbf16>
    %c0_7 = arith.constant 0 : index
    %c0_8 = arith.constant 0 : index
    %12 = vector.load %arg15[%c0_7, %c0_8] : memref<8x32xbf16, #tpu.memory_space<vmem>>, vector<8x32xbf16>
    %c0_9 = arith.constant 0 : index
    %c0_10 = arith.constant 0 : index
    %13 = vector.load %arg16[%c0_9, %c0_10] : memref<8x32xbf16, #tpu.memory_space<vmem>>, vector<8x32xbf16>
    %14 = tpu.iota {dimensions = array<i32: 1>} : vector<1x32xi32>
    %cst_11 = arith.constant 0.000000e+00 : bf16
    %15 = vector.broadcast %cst_11 : bf16 to vector<8x32xbf16>
    %cst_12 = arith.constant 0.000000e+00 : bf16
    %16 = vector.broadcast %cst_12 : bf16 to vector<8x32xbf16>
    %cst_13 = arith.constant 0.000000e+00 : f32
    %17 = vector.broadcast %cst_13 : f32 to vector<8x32xf32>
    %c0_i32_14 = arith.constant 0 : i32
    %18 = vector.broadcast %c0_i32_14 : i32 to vector<1x32xi32>
    %19 = arith.cmpi sge, %14, %18 : vector<1x32xi32>
    %c8_i32 = arith.constant 8 : i32
    %20 = vector.broadcast %c8_i32 : i32 to vector<1x32xi32>
    %21 = arith.cmpi slt, %14, %20 : vector<1x32xi32>
    %22 = arith.andi %19, %21 : vector<1x32xi1>
    %23 = vector.shape_cast %22 : vector<1x32xi1> to vector<1x32xi1>
    %24 = vector.broadcast %23 : vector<1x32xi1> to vector<8x32xi1>
    %25 = arith.select %24, %11, %15 : vector<8x32xi1>, vector<8x32xbf16>
    %cst_15 = arith.constant dense<0.000000e+00> : vector<8x8xf32>
    %26 = tpu.matmul %25, %12, %cst_15 {dimension_numbers = #tpu.dot_dimension_numbers<[1], [1], [0], [0], [0, 0, 1, 0], [], []>} : vector<8x32xbf16>, vector<8x32xbf16>, vector<8x8xf32> -> vector<8x8xf32>
    %cst_16 = arith.constant 0.353553385 : f32
    %27 = vector.broadcast %cst_16 : f32 to vector<8x8xf32>
    %28 = arith.mulf %26, %27 : vector<8x8xf32>
    %cst_17 = arith.constant dense<0xFF800000> : vector<8xf32>
    %29 = vector.multi_reduction <maximumf>, %28, %cst_17 [1] : vector<8x8xf32> to vector<8xf32>
    %30 = vector.shape_cast %29 : vector<8xf32> to vector<8x1xf32>
    %31 = vector.broadcast %30 : vector<8x1xf32> to vector<8x8xf32>
    %32 = arith.subf %28, %31 : vector<8x8xf32>
    %33 = math.exp %32 : vector<8x8xf32>
    %cst_18 = arith.constant dense<0.000000e+00> : vector<8xf32>
    %34 = vector.multi_reduction <add>, %33, %cst_18 [1] : vector<8x8xf32> to vector<8xf32>
    %35 = vector.shape_cast %34 : vector<8xf32> to vector<8x1xf32>
    %36 = tpu.reciprocal %35 {approx = true} : vector<8x1xf32> -> vector<8x1xf32>
    %37 = vector.broadcast %36 : vector<8x1xf32> to vector<8x8xf32>
    %38 = arith.mulf %33, %37 : vector<8x8xf32>
    %39 = vector.shape_cast %22 : vector<1x32xi1> to vector<1x32xi1>
    %40 = vector.broadcast %39 : vector<1x32xi1> to vector<8x32xi1>
    %41 = arith.select %40, %13, %16 : vector<8x32xi1>, vector<8x32xbf16>
    %42 = arith.truncf %38 : vector<8x8xf32> to vector<8x8xbf16>
    %cst_19 = arith.constant dense<0.000000e+00> : vector<8x32xf32>
    %43 = tpu.matmul %42, %41, %cst_19 {dimension_numbers = #tpu.dot_dimension_numbers<[1], [0], [0], [1], [0, 0, 1, 1], [], []>} : vector<8x8xbf16>, vector<8x32xbf16>, vector<8x32xf32> -> vector<8x32xf32>
    %44 = arith.addf %17, %43 : vector<8x32xf32>
    %c8_i32_20 = arith.constant 8 : i32
    %45 = vector.broadcast %c8_i32_20 : i32 to vector<1x32xi32>
    %46 = arith.cmpi sge, %14, %45 : vector<1x32xi32>
    %c16_i32 = arith.constant 16 : i32
    %47 = vector.broadcast %c16_i32 : i32 to vector<1x32xi32>
    %48 = arith.cmpi slt, %14, %47 : vector<1x32xi32>
    %49 = arith.andi %46, %48 : vector<1x32xi1>
    %50 = vector.shape_cast %49 : vector<1x32xi1> to vector<1x32xi1>
    %51 = vector.broadcast %50 : vector<1x32xi1> to vector<8x32xi1>
    %52 = arith.select %51, %11, %15 : vector<8x32xi1>, vector<8x32xbf16>
    %cst_21 = arith.constant dense<0.000000e+00> : vector<8x8xf32>
    %53 = tpu.matmul %52, %12, %cst_21 {dimension_numbers = #tpu.dot_dimension_numbers<[1], [1], [0], [0], [0, 0, 1, 0], [], []>} : vector<8x32xbf16>, vector<8x32xbf16>, vector<8x8xf32> -> vector<8x8xf32>
    %cst_22 = arith.constant 0.353553385 : f32
    %54 = vector.broadcast %cst_22 : f32 to vector<8x8xf32>
    %55 = arith.mulf %53, %54 : vector<8x8xf32>
    %cst_23 = arith.constant dense<0xFF800000> : vector<8xf32>
    %56 = vector.multi_reduction <maximumf>, %55, %cst_23 [1] : vector<8x8xf32> to vector<8xf32>
    %57 = vector.shape_cast %56 : vector<8xf32> to vector<8x1xf32>
    %58 = vector.broadcast %57 : vector<8x1xf32> to vector<8x8xf32>
    %59 = arith.subf %55, %58 : vector<8x8xf32>
    %60 = math.exp %59 : vector<8x8xf32>
    %cst_24 = arith.constant dense<0.000000e+00> : vector<8xf32>
    %61 = vector.multi_reduction <add>, %60, %cst_24 [1] : vector<8x8xf32> to vector<8xf32>
    %62 = vector.shape_cast %61 : vector<8xf32> to vector<8x1xf32>
    %63 = tpu.reciprocal %62 {approx = true} : vector<8x1xf32> -> vector<8x1xf32>
    %64 = vector.broadcast %63 : vector<8x1xf32> to vector<8x8xf32>
    %65 = arith.mulf %60, %64 : vector<8x8xf32>
    %66 = vector.shape_cast %49 : vector<1x32xi1> to vector<1x32xi1>
    %67 = vector.broadcast %66 : vector<1x32xi1> to vector<8x32xi1>
    %68 = arith.select %67, %13, %16 : vector<8x32xi1>, vector<8x32xbf16>
    %69 = arith.truncf %65 : vector<8x8xf32> to vector<8x8xbf16>
    %cst_25 = arith.constant dense<0.000000e+00> : vector<8x32xf32>
    %70 = tpu.matmul %69, %68, %cst_25 {dimension_numbers = #tpu.dot_dimension_numbers<[1], [0], [0], [1], [0, 0, 1, 1], [], []>} : vector<8x8xbf16>, vector<8x32xbf16>, vector<8x32xf32> -> vector<8x32xf32>
    %71 = arith.addf %44, %70 : vector<8x32xf32>
    %c16_i32_26 = arith.constant 16 : i32
    %72 = vector.broadcast %c16_i32_26 : i32 to vector<1x32xi32>
    %73 = arith.cmpi sge, %14, %72 : vector<1x32xi32>
    %c24_i32 = arith.constant 24 : i32
    %74 = vector.broadcast %c24_i32 : i32 to vector<1x32xi32>
    %75 = arith.cmpi slt, %14, %74 : vector<1x32xi32>
    %76 = arith.andi %73, %75 : vector<1x32xi1>
    %77 = vector.shape_cast %76 : vector<1x32xi1> to vector<1x32xi1>
    %78 = vector.broadcast %77 : vector<1x32xi1> to vector<8x32xi1>
    %79 = arith.select %78, %11, %15 : vector<8x32xi1>, vector<8x32xbf16>
    %cst_27 = arith.constant dense<0.000000e+00> : vector<8x8xf32>
    %80 = tpu.matmul %79, %12, %cst_27 {dimension_numbers = #tpu.dot_dimension_numbers<[1], [1], [0], [0], [0, 0, 1, 0], [], []>} : vector<8x32xbf16>, vector<8x32xbf16>, vector<8x8xf32> -> vector<8x8xf32>
    %cst_28 = arith.constant 0.353553385 : f32
    %81 = vector.broadcast %cst_28 : f32 to vector<8x8xf32>
    %82 = arith.mulf %80, %81 : vector<8x8xf32>
    %cst_29 = arith.constant dense<0xFF800000> : vector<8xf32>
    %83 = vector.multi_reduction <maximumf>, %82, %cst_29 [1] : vector<8x8xf32> to vector<8xf32>
    %84 = vector.shape_cast %83 : vector<8xf32> to vector<8x1xf32>
    %85 = vector.broadcast %84 : vector<8x1xf32> to vector<8x8xf32>
    %86 = arith.subf %82, %85 : vector<8x8xf32>
    %87 = math.exp %86 : vector<8x8xf32>
    %cst_30 = arith.constant dense<0.000000e+00> : vector<8xf32>
    %88 = vector.multi_reduction <add>, %87, %cst_30 [1] : vector<8x8xf32> to vector<8xf32>
    %89 = vector.shape_cast %88 : vector<8xf32> to vector<8x1xf32>
    %90 = tpu.reciprocal %89 {approx = true} : vector<8x1xf32> -> vector<8x1xf32>
    %91 = vector.broadcast %90 : vector<8x1xf32> to vector<8x8xf32>
    %92 = arith.mulf %87, %91 : vector<8x8xf32>
    %93 = vector.shape_cast %76 : vector<1x32xi1> to vector<1x32xi1>
    %94 = vector.broadcast %93 : vector<1x32xi1> to vector<8x32xi1>
    %95 = arith.select %94, %13, %16 : vector<8x32xi1>, vector<8x32xbf16>
    %96 = arith.truncf %92 : vector<8x8xf32> to vector<8x8xbf16>
    %cst_31 = arith.constant dense<0.000000e+00> : vector<8x32xf32>
    %97 = tpu.matmul %96, %95, %cst_31 {dimension_numbers = #tpu.dot_dimension_numbers<[1], [0], [0], [1], [0, 0, 1, 1], [], []>} : vector<8x8xbf16>, vector<8x32xbf16>, vector<8x32xf32> -> vector<8x32xf32>
    %98 = arith.addf %71, %97 : vector<8x32xf32>
    %c24_i32_32 = arith.constant 24 : i32
    %99 = vector.broadcast %c24_i32_32 : i32 to vector<1x32xi32>
    %100 = arith.cmpi sge, %14, %99 : vector<1x32xi32>
    %c32_i32 = arith.constant 32 : i32
    %101 = vector.broadcast %c32_i32 : i32 to vector<1x32xi32>
    %102 = arith.cmpi slt, %14, %101 : vector<1x32xi32>
    %103 = arith.andi %100, %102 : vector<1x32xi1>
    %104 = vector.shape_cast %103 : vector<1x32xi1> to vector<1x32xi1>
    %105 = vector.broadcast %104 : vector<1x32xi1> to vector<8x32xi1>
    %106 = arith.select %105, %11, %15 : vector<8x32xi1>, vector<8x32xbf16>
    %cst_33 = arith.constant dense<0.000000e+00> : vector<8x8xf32>
    %107 = tpu.matmul %106, %12, %cst_33 {dimension_numbers = #tpu.dot_dimension_numbers<[1], [1], [0], [0], [0, 0, 1, 0], [], []>} : vector<8x32xbf16>, vector<8x32xbf16>, vector<8x8xf32> -> vector<8x8xf32>
    %cst_34 = arith.constant 0.353553385 : f32
    %108 = vector.broadcast %cst_34 : f32 to vector<8x8xf32>
    %109 = arith.mulf %107, %108 : vector<8x8xf32>
    %cst_35 = arith.constant dense<0xFF800000> : vector<8xf32>
    %110 = vector.multi_reduction <maximumf>, %109, %cst_35 [1] : vector<8x8xf32> to vector<8xf32>
    %111 = vector.shape_cast %110 : vector<8xf32> to vector<8x1xf32>
    %112 = vector.broadcast %111 : vector<8x1xf32> to vector<8x8xf32>
    %113 = arith.subf %109, %112 : vector<8x8xf32>
    %114 = math.exp %113 : vector<8x8xf32>
    %cst_36 = arith.constant dense<0.000000e+00> : vector<8xf32>
    %115 = vector.multi_reduction <add>, %114, %cst_36 [1] : vector<8x8xf32> to vector<8xf32>
    %116 = vector.shape_cast %115 : vector<8xf32> to vector<8x1xf32>
    %117 = tpu.reciprocal %116 {approx = true} : vector<8x1xf32> -> vector<8x1xf32>
    %118 = vector.broadcast %117 : vector<8x1xf32> to vector<8x8xf32>
    %119 = arith.mulf %114, %118 : vector<8x8xf32>
    %120 = vector.shape_cast %103 : vector<1x32xi1> to vector<1x32xi1>
    %121 = vector.broadcast %120 : vector<1x32xi1> to vector<8x32xi1>
    %122 = arith.select %121, %13, %16 : vector<8x32xi1>, vector<8x32xbf16>
    %123 = arith.truncf %119 : vector<8x8xf32> to vector<8x8xbf16>
    %cst_37 = arith.constant dense<0.000000e+00> : vector<8x32xf32>
    %124 = tpu.matmul %123, %122, %cst_37 {dimension_numbers = #tpu.dot_dimension_numbers<[1], [0], [0], [1], [0, 0, 1, 1], [], []>} : vector<8x8xbf16>, vector<8x32xbf16>, vector<8x32xf32> -> vector<8x32xf32>
    %125 = arith.addf %98, %124 : vector<8x32xf32>
    %126 = arith.truncf %125 : vector<8x32xf32> to vector<8x32xbf16>
    %c0_38 = arith.constant 0 : index
    %c0_39 = arith.constant 0 : index
    %127 = vector.load %arg10[%c0_38, %c0_39] : memref<32x32xbf16, #tpu.memory_space<vmem>>, vector<32x32xbf16>
    %cst_40 = arith.constant dense<0.000000e+00> : vector<8x32xf32>
    %128 = tpu.matmul %126, %127, %cst_40 {dimension_numbers = #tpu.dot_dimension_numbers<[1], [0], [0], [1], [0, 0, 1, 1], [], []>} : vector<8x32xbf16>, vector<32x32xbf16>, vector<8x32xf32> -> vector<8x32xf32>
    %c0_41 = arith.constant 0 : index
    %c0_42 = arith.constant 0 : index
    %129 = vector.load %arg11[%c0_41, %c0_42] : memref<1x32xf32, #tpu.memory_space<vmem>>, vector<1x32xf32>
    %130 = vector.broadcast %129 : vector<1x32xf32> to vector<8x32xf32>
    %131 = arith.addf %128, %130 : vector<8x32xf32>
    %132 = arith.addf %131, %4 : vector<8x32xf32>
    %cst_43 = arith.constant dense<0.000000e+00> : vector<8xf32>
    %133 = vector.multi_reduction <add>, %132, %cst_43 [1] : vector<8x32xf32> to vector<8xf32>
    %134 = vector.shape_cast %133 : vector<8xf32> to vector<8x1xf32>
    %cst_44 = arith.constant 3.200000e+01 : f32
    %135 = vector.broadcast %cst_44 : f32 to vector<8x1xf32>
    %136 = arith.divf %134, %135 : vector<8x1xf32>
    %137 = vector.broadcast %136 : vector<8x1xf32> to vector<8x32xf32>
    %138 = arith.subf %132, %137 : vector<8x32xf32>
    %139 = arith.mulf %138, %138 : vector<8x32xf32>
    %cst_45 = arith.constant dense<0.000000e+00> : vector<8xf32>
    %140 = vector.multi_reduction <add>, %139, %cst_45 [1] : vector<8x32xf32> to vector<8xf32>
    %141 = vector.shape_cast %140 : vector<8xf32> to vector<8x1xf32>
    %cst_46 = arith.constant 3.200000e+01 : f32
    %142 = vector.broadcast %cst_46 : f32 to vector<8x1xf32>
    %143 = arith.divf %141, %142 : vector<8x1xf32>
    %cst_47 = arith.constant 9.99999974E-6 : f32
    %144 = vector.broadcast %cst_47 : f32 to vector<8x1xf32>
    %145 = arith.addf %143, %144 : vector<8x1xf32>
    %146 = math.rsqrt %145 : vector<8x1xf32>
    %147 = vector.broadcast %146 : vector<8x1xf32> to vector<8x32xf32>
    %148 = arith.mulf %138, %147 : vector<8x32xf32>
    %c0_48 = arith.constant 0 : index
    %c0_49 = arith.constant 0 : index
    %149 = vector.load %arg12[%c0_48, %c0_49] : memref<1x32xf32, #tpu.memory_space<vmem>>, vector<1x32xf32>
    %150 = vector.broadcast %149 : vector<1x32xf32> to vector<8x32xf32>
    %151 = arith.mulf %148, %150 : vector<8x32xf32>
    %c0_50 = arith.constant 0 : index
    %c0_51 = arith.constant 0 : index
    %152 = vector.load %arg13[%c0_50, %c0_51] : memref<1x32xf32, #tpu.memory_space<vmem>>, vector<1x32xf32>
    %153 = vector.broadcast %152 : vector<1x32xf32> to vector<8x32xf32>
    %154 = arith.addf %151, %153 : vector<8x32xf32>
    %c0_52 = arith.constant 0 : index
    %c0_53 = arith.constant 0 : index
    %c0_54 = arith.constant 0 : index
    %155 = vector.load %arg14[%c0_52, %c0_53, %c0_54] : memref<1x8x32xf32, #tpu.memory_space<vmem>>, vector<1x8x32xf32>
    %156 = vector.shape_cast %155 : vector<1x8x32xf32> to vector<8x32xf32>
    %157 = vector.shape_cast %154 : vector<8x32xf32> to vector<1x8x32xf32>
    tpu.vector_store %arg14[%c0_52, %c0_53, %c0_54], %157 {strides = array<i32>} : memref<1x8x32xf32, #tpu.memory_space<vmem>>, vector<1x8x32xf32>,
    return
  }
  func.func @transform_0(%arg0: i32, %arg1: i32) -> (i32, i32, i32) {
    %c0_i32 = arith.constant 0 : i32
    %c0_i32_0 = arith.constant 0 : i32
    return %arg0, %arg1, %c0_i32 : i32, i32, i32
  }
  func.func @transform_1(%arg0: i32, %arg1: i32) -> (i32, i32, i32) {
    %c0_i32 = arith.constant 0 : i32
    %c0_i32_0 = arith.constant 0 : i32
    %c0_i32_1 = arith.constant 0 : i32
    return %arg0, %c0_i32, %c0_i32_0 : i32, i32, i32
  }
  func.func @transform_2(%arg0: i32, %arg1: i32) -> (i32, i32) {
    %c0_i32 = arith.constant 0 : i32
    %c0_i32_0 = arith.constant 0 : i32
    %c0_i32_1 = arith.constant 0 : i32
    return %c0_i32, %c0_i32_0 : i32, i32
  }
  func.func @transform_3(%arg0: i32, %arg1: i32) -> (i32, i32) {
    %c0_i32 = arith.constant 0 : i32
    %c0_i32_0 = arith.constant 0 : i32
    %c0_i32_1 = arith.constant 0 : i32
    return %c0_i32, %c0_i32_0 : i32, i32
  }
  func.func @transform_4(%arg0: i32, %arg1: i32) -> (i32, i32) {
    %c0_i32 = arith.constant 0 : i32
    %c0_i32_0 = arith.constant 0 : i32
    %c0_i32_1 = arith.constant 0 : i32
    return %c0_i32, %c0_i32_0 : i32, i32
  }
  func.func @transform_5(%arg0: i32, %arg1: i32) -> (i32, i32) {
    %c0_i32 = arith.constant 0 : i32
    %c0_i32_0 = arith.constant 0 : i32
    %c0_i32_1 = arith.constant 0 : i32
    return %c0_i32, %c0_i32_0 : i32, i32
  }
  func.func @transform_6(%arg0: i32, %arg1: i32) -> (i32, i32) {
    %c0_i32 = arith.constant 0 : i32
    %c0_i32_0 = arith.constant 0 : i32
    %c0_i32_1 = arith.constant 0 : i32
    return %c0_i32, %c0_i32_0 : i32, i32
  }
  func.func @transform_7(%arg0: i32, %arg1: i32) -> (i32, i32) {
    %c0_i32 = arith.constant 0 : i32
    %c0_i32_0 = arith.constant 0 : i32
    %c0_i32_1 = arith.constant 0 : i32
    return %c0_i32, %c0_i32_0 : i32, i32
  }
  func.func @transform_8(%arg0: i32, %arg1: i32) -> (i32, i32) {
    %c0_i32 = arith.constant 0 : i32
    %c0_i32_0 = arith.constant 0 : i32
    %c0_i32_1 = arith.constant 0 : i32
    return %c0_i32, %c0_i32_0 : i32, i32
  }
  func.func @transform_9(%arg0: i32, %arg1: i32) -> (i32, i32) {
    %c0_i32 = arith.constant 0 : i32
    %c0_i32_0 = arith.constant 0 : i32
    %c0_i32_1 = arith.constant 0 : i32
    return %c0_i32, %c0_i32_0 : i32, i32
  }
  func.func @transform_10(%arg0: i32, %arg1: i32) -> (i32, i32) {
    %c0_i32 = arith.constant 0 : i32
    %c0_i32_0 = arith.constant 0 : i32
    %c0_i32_1 = arith.constant 0 : i32
    return %c0_i32, %c0_i32_0 : i32, i32
  }
  func.func @transform_11(%arg0: i32, %arg1: i32) -> (i32, i32) {
    %c0_i32 = arith.constant 0 : i32
    %c0_i32_0 = arith.constant 0 : i32
    %c0_i32_1 = arith.constant 0 : i32
    return %c0_i32, %c0_i32_0 : i32, i32
  }
  func.func @transform_12(%arg0: i32, %arg1: i32) -> (i32, i32, i32) {
    %c0_i32 = arith.constant 0 : i32
    %c0_i32_0 = arith.constant 0 : i32
    return %arg0, %arg1, %c0_i32 : i32, i32, i32
  }
}

</mosaic_0001>

<bundles_post_ra>
// kernel: cross_attention_encoder_layer.3
= control target key start
LH: loop header
LB: loop body
LE: loop exit
PB: predicated region body
PF: predicated region fallthrough
CT: control target
= control target key end

     0   :  { %12 = vsyncpa [#allocation4], 0  ;;  %s1113_s0 = inlined_call_operand.vmem [shape: f32[16,32], index: 0, kind: input, shape index: {}]   ;;  %s1114_s1 = inlined_call_operand.vmem [shape: bf16[32,128], index: 1, kind: input, shape index: {}]   ;;  %s1115_s2 = inlined_call_operand.vmem [shape: f32[1,128], index: 2, kind: input, shape index: {}]   ;;  %s1116_s3 = inlined_call_operand.vmem [shape: bf16[128,32], index: 3, kind: input, shape index: {}]   ;;  %s1117_s4 = inlined_call_operand.vmem [shape: f32[1,32], index: 4, kind: input, shape index: {}]   ;;  %s1118_s5 = inlined_call_operand.vmem [shape: f32[1,32], index: 5, kind: input, shape index: {}]   ;;  %s1119_s6 = inlined_call_operand.vmem [shape: f32[1,32], index: 6, kind: input, shape index: {}]   ;;  %s1120_s7 = inlined_call_operand.hbm [shape: f32[16,32], index: 7, kind: output, shape index: {}]  }
   0x1   :  { %14 = vsyncpa [#allocation4 + $0x1], 0  ;;  %s953_s24 = smov 0   ;;  %s955_s25 = smov 0  }
   0x2   :  { %s957_s26 = smov 0   ;;  %s959_s27 = smov 0  }
   0x3   :  { %s961_s28 = smov 0   ;;  %s963_s29 = smov 0  }
   0x4 LB: > { %s692_s30 = sadd.s32 4294967295, %s908_s29   ;;  %s693_s8 = sadd.s32 4294967294, %s908_s29   ;;  %s908_s29 = sphi %s963_s29, %s20_s29   ;;  %s904_s28 = sphi %s961_s28, %s1127_s28   ;;  %s900_s27 = sphi %s959_s27, %s1126_s27   ;;  %s896_s26 = sphi %s957_s26, %s1125_s26   ;;  %s892_s25 = sphi %s955_s25, %s1124_s25   ;;  %s888_s24 = sphi %s953_s24, %s1123_s24  }
   0x5   : > { %s32_s9 = sadd.s32 1, %s904_s28  ;;  %s206_s10 = sadd.s32 1, %s896_s26 }
   0x6   : > { %p34_p0 = scmp.ge.s32.totalorder %s32_s9, 2  ;;  %p216_p1 = scmp.ne.s32.totalorder %s896_s26, %s892_s25 }
   0x7   : > { %p217_p2 = scmp.eq.s32.totalorder %s692_s30, 1  ;;  %p222_p3 = scmp.ne.s32.totalorder %s892_s25, %s888_s24 }
   0x8   : > { %s1129_s9 = smov (%p34_p0, %s32_s9), 0  ;;  %p223_p5 = scmp.eq.s32.totalorder %s693_s8, 1 }
   0x9   : > { %p993_p4 = por %p217_p2, %p216_p1  ;;  %s203_s12 = ssub.s32 %s904_s28, %s1129_s9 }
   0xa   : > { %p699_p6 = scmp.ge.s32.totalorder %s908_s29, 1  ;;  %p204_p7 = scmp.eq.s32.totalorder %s203_s12, 0 }
   0xb   : > { %p1000_p8 = por %p223_p5, %p222_p3  ;;  %p279_p9 = scmp.lt.s32.totalorder %s908_s29, 3 }
   0xc   : > { %s1006_s14 = scalar_select %p204_p7, %s896_s26, %s206_s10  }
   0xd   : > { %p280_p10 = pnand %p699_p6, %p279_p9 }
   0xe   : > { %v818_v0 = vld [vmem:[%s1114_s1] sm:$0xff] (!%p280_p10)   ;;  %v910_v1 = vmov (!%p280_p10), 0.0   ;;  %v819_v2 = vld [vmem:[%s1114_s1 + $0x8] sm:$0xff] (!%p280_p10)   ;;  %vm911_vm0 = vmmov (!%p280_p10), 0   ;;  %p322_p11 = scmp.lt.s32.totalorder (!%p280_p10), %s900_s27, 1  ;;  %vm344_vm1 = vcmask (!%p280_p10), 261120  }
   0xf   : > { %283 = sbr.rel (%p280_p10) target bundleno = 800 (0x320), region = 48  ;;  %733 = vmatprep.subr.bf16.mxu0 (!%p280_p10), %v910_v1  ;;  %741 = vmatprep.subr.bf16.mxu1 (!%p280_p10), %v910_v1  ;;  %345 = vst.msk [vmem:[#allocation2] sm:$0xff] (!%p280_p10), %vm344_vm1, %v910_v1  ;;  %v820_v3 = vld [vmem:[%s1116_s3] sm:$0xff] (!%p280_p10)   ;;  %v821_v4 = vld [vmem:[%s1116_s3 + $0x8] sm:$0xff] (!%p280_p10)   ;;  %v822_v6 = vld [vmem:[%s1116_s3 + $0x10] sm:$0xff] (!%p280_p10)   ;;  %s319_s18 = sand.u32 (!%p280_p10), 1, %s892_s25  }
  0x10   : > { %734 = vmatpush3.bf16.msra.mxu0 (!%p280_p10), %v818_v0  ;;  %737 = vmatprep.mubr.msk.bf16.mxu0 (!%p280_p10), %vm911_vm0, %v910_v1  ;;  %v823_v8 = vld [vmem:[%s1116_s3 + $0x18] sm:$0xff] (!%p280_p10)   ;;  %v824_v9 = vld [vmem:[%s1116_s3 + $0x20] sm:$0xff] (!%p280_p10)   ;;  %v825_v10 = vld [vmem:[%s1116_s3 + $0x28] sm:$0xff] (!%p280_p10)   ;;  %s700_s19 = sshll.u32 (!%p280_p10), %s319_s18, 3  ;;  %s570_s17 = scalar_lea.sflag (!%p280_p10), [#allocation4], %s319_s18 }
  0x11   : > { %735 = vmatprep.subr.bf16.mxu0 (!%p280_p10), %v910_v1  ;;  %757 = vmatprep.mubr.msk.bf16.mxu1 (!%p280_p10), %vm911_vm0, %v910_v1  ;;  %v826_v11 = vld [vmem:[%s1116_s3 + $0x30] sm:$0xff] (!%p280_p10)   ;;  %v827_v12 = vld [vmem:[%s1116_s3 + $0x38] sm:$0xff] (!%p280_p10)   ;;  %v702_v13 = vld [vmem:[%s1115_s2] ss:$0 sm:$0xff] (!%p280_p10)  ;;  %s321_s8 = scalar_lea.vmem (!%p280_p10), [#allocation3], %s700_s19 }
  0x12   : > { %742 = vmatpush3.bf16.msra.mxu1 (!%p280_p10), %v820_v3  ;;  %v714_v27 = vld [vmem:[%s1117_s4] ss:$0 sm:$0xff] (!%p280_p10)  ;;  %s583_s10 = sshll.u32 (!%p280_p10), %s321_s8, 4  ;;  %s1067_s10 = int_to_ptr.vmem [resolvable:$true] %s583_s10 }
  0x13   : > { %743 = vmatprep.subr.bf16.mxu1 (!%p280_p10), %v910_v1  ;;  %v715_v41 = vld [vmem:[%s1118_s5] ss:$0 sm:$0xff] (!%p280_p10)  ;;  %s830_s20 = scalar_lea.vmem (!%p280_p10), %s1067_s10, 128 }
  0x14   : > { %736 = vmatpush3.bf16.msra.mxu0 (!%p280_p10), %v819_v2  ;;  %v716_v43 = vld [vmem:[%s1119_s6] ss:$0 sm:$0xff] (!%p280_p10)  ;;  %p831_p12 = scmp.ne.s32.totalorder (!%p280_p10), %s1067_s10, %s830_s20 }
  0x16   : > { %s323_s21 = scalar_select %p322_p11, %s900_s27, 1  ;;  %744 = vmatpush3.bf16.msra.mxu1 %v821_v4  ;;  %v416_v21 = vld [vmem:[#allocation2] sm:$0xff] }
  0x17   : > { %745 = vmatprep.subr.bf16.mxu1 %v910_v1  ;;  %p832_p13 = pnand %p831_p12, %p993_p4 }
  0x18   : > { %s701_s30 = sshll.u32 %s323_s21, 3 }
  0x19   : > { %s325_s12 = scalar_lea.vmem %s1113_s0, %s701_s30  ;;  %s718_s30 = sshll.u32 %s900_s27, 7 }
  0x1a   : > { %v346_v5 = vld [vmem:[%s325_s12] sm:$0xff]  ;;  %746 = vmatpush3.bf16.msra.mxu1 %v822_v6  ;;  %s1065_s16 = scalar_lea.hbm %s1120_s7, %s718_s30  ;;  %p833_p0 = pneg %p832_p13 }
  0x1b   : > { %v347_v7 = vpack.c.bf16 %v346_v5, %v346_v5  ;;  %747 = vmatprep.subr.bf16.mxu1 %v910_v1  ;;  %s912_s27 = smov [#allocation3]  }
  0x1c   : > { %s834_s19 = sshll.u32 %s912_s27, 4  ;;  %s835_s19 = int_to_ptr.vmem [resolvable:$false] %s834_s19 }
  0x1d   : > { %738 = vmatmul.mubr.msk.bf16.vlgmr.msra.gmra.mrb[0].mxu0 %vm344_vm1, %v347_v7  ;;  %s836_s21 = scalar_lea.vmem %s835_s19, 256  ;;  %p837_p1 = scmp.lt.s32.totalorder %s1067_s10, %s835_s19 }
  0x1e   : > { %748 = vmatpush3.bf16.msra.mxu1 %v823_v8  ;;  %p838_p2 = scmp.lt.s32.totalorder %s836_s21, %s830_s20 }
  0x1f   : > { %749 = vmatprep.subr.bf16.mxu1 %v910_v1 }
  0x20   : > { %p839_p3 = por %p838_p2, %p837_p1 }
  0x22   : > { %750 = vmatpush3.bf16.msra.mxu1 %v824_v9  ;;  %p840_p5 = pnand %p839_p3, %p833_p0 }
  0x23   : > { %751 = vmatprep.subr.bf16.mxu1 %v910_v1 }
  0x26   : > { %752 = vmatpush3.bf16.msra.mxu1 %v825_v10 }
  0x27   : > { %753 = vmatprep.subr.bf16.mxu1 %v910_v1 }
  0x2a   : > { %754 = vmatpush3.bf16.msra.mxu1 %v826_v11 }
  0x2b   : > { %755 = vmatprep.subr.bf16.mxu1 %v910_v1 }
  0x2e   : > { %756 = vmatpush3.bf16.msra.mxu1 %v827_v12 }
  0xf0   : > { %v409_v14 = vpop.f32.mrb[0].mxu0 }
  0xf1   : > { %v410_v15 = vadd.f32 %v702_v13, %v409_v14  ;;  %v739_v16 = vpop.f32.mrb[1].mxu0 }
  0xf2   : > { %v412_v17 = vpop.f32.mrb[2].mxu0 }
  0xf3   : > { %v415_v18 = vmax.f32 %v410_v15, 0.0  ;;  %v740_v19 = vpop.f32.mrb[3].mxu0 }
  0xf5   : > { %v417_v20 = vpack.c.bf16 %v415_v18, %v415_v18 }
  0xf7   : > { %758 = vmatmul.mubr.bf16.vlgmr.msra.gmra.mrb[0].mxu1 %v417_v20 }
 0x1ca   : > { %v516_v22 = vpop.f32.mrb[0].mxu1 }
 0x1cb   : > { %v522_v23 = vadd.f32 %v516_v22, %v416_v21  ;;  %v759_v24 = vpop.f32.mrb[1].mxu1 }
 0x1cc   : > { %v519_v25 = vpop.f32.mrb[2].mxu1 }
 0x1cd   : > { %523 = vst.msk [vmem:[#allocation2] sm:$0xff] %vm344_vm1, %v522_v23  ;;  %v760_v26 = vpop.f32.mrb[3].mxu1 }
 0x1d4   : > { %v527_v28 = vld [vmem:[#allocation2] sm:$0xff] }
 0x1d5   : > { %v535_v29 = vadd.f32 %v714_v27, %v527_v28 }
 0x1d7   : > { %v537_v30 = vadd.f32 %v535_v29, %v346_v5 }
 0x1d9   : > { %v538_v31 = vsel %vm344_vm1, %v537_v30, 0.0 }
 0x1da   : > { %539 = vadd.xlane.f32.xlu0 %v538_v31 }
 0x267   : > { %v540_v32 = vpop.xlane.xlu0 %539 }
 0x268   : > { %v542_v33 = vmul.f32 0.03125, %v540_v32 }
 0x26a   : > { %v543_v34 = vsub.f32 %v537_v30, %v542_v33 }
 0x26c   : > { %v544_v35 = vmul.f32 %v543_v34, %v543_v34 }
 0x26e   : > { %v545_v36 = vsel %vm344_vm1, %v544_v35, 0.0 }
 0x26f   : > { %546 = vadd.xlane.f32.xlu0 %v545_v36 }
 0x2fc   : > { %v547_v37 = vpop.xlane.xlu0 %546 }
 0x2fd   : > { %v548_v38 = vmul.f32 0.03125, %v547_v37 }
 0x2ff   : > { %v549_v39 = vadd.f32 1e-05, %v548_v38 }
 0x301   : > { %828 = vrsqrt.f32 %v549_v39 }
 0x30b   : > { %v829_v40 = vpop.eup %828 }
 0x30c   : > { %v551_v42 = vmul.f32 %v829_v40, %v543_v34 }
 0x30e   : > { %v559_v44 = vmul.f32 %v715_v41, %v551_v42 }
 0x310   : > { %v567_v45 = vadd.f32 %v716_v43, %v559_v44 }
 0x312   : > { %568 = vst.msk [vmem:[%s321_s8] sm:$0xff] %vm344_vm1, %v567_v45 }
 0x313   : > { %843 = shalt.err (!%p840_p5)
}
 0x314   : > { %s844_s18 = scalar_lea.hbm %s1065_s16, 128  ;;  %s848_s30 = scalar_lea.hbm %s1120_s7, 256 }
 0x315   : > { %p845_p6 = scmp.ne.s32.totalorder %s1065_s16, %s844_s18  ;;  %p849_p10 = scmp.lt.u32.totalorder %s1065_s16, %s1120_s7 }
 0x316   : > { %p850_p11 = scmp.lt.u32.totalorder %s848_s30, %s844_s18  ;;  %p852_p13 = scmp.lt.u32.totalorder %s844_s18, %s1065_s16 }
 0x317   : > { %p846_p7 = pnand %p845_p6, %p993_p4 }
 0x318   : > { %p851_p12 = por %p850_p11, %p849_p10 }
 0x319   : > { %p847_p9 = pneg %p846_p7 }
 0x31a   : > { %p853_p0 = por %p852_p13, %p851_p12 }
 0x31c   : > { %p854_p1 = pnand %p853_p0, %p847_p9 }
 0x31e   : > { %857 = shalt.err (!%p854_p1)
}
 0x31f   : > { %761 = dma.vmem_to_hbm [thread:$0]  (%p993_p4), %s1067_s10, 128, %s1065_s16, %s570_s17  }
 0x320 PF: > { %p767_p2 = scmp.ge.s32.totalorder %s908_s29, 2  ;;  %s595_s15 = sand.u32 1, %s888_s24  }
 0x321   : > { %s596_s20 = scalar_lea.sflag [#allocation4], %s595_s15 }
 0x322   : > { %p764_p3 = pnand %p767_p2, %p1000_p8 }
 0x324   : > { %883 = dma.done.wait (!%p764_p3), %s596_s20, 128  }
 0x325   : > { %885 = vsyncadd (!%p764_p3), %s596_s20, 4294967168  ;;  %s20_s29 = sadd.s32 1, %s908_s29   ;;  %s1123_s24 = smov %s892_s25 }
 0x326   : > { %p17_p5 = scmp.ge.s32.totalorder %s20_s29, 4   ;;  %s1124_s25 = smov %s896_s26 }
 0x327   : > { %s1125_s26 = smov %s1006_s14  ;;  %s1126_s27 = smov %s904_s28 }
 0x328   : > { %s1127_s28 = smov %s1129_s9  ;;  %19 = sbr.rel (!%p17_p5) target bundleno = 4 (0x4), region = 100 }
 0x32f   :  { %601 = vsyncpa [#allocation4], 1 }
 0x330   :  { %603 = vsyncpa [#allocation4 + $0x1], 1 }

// kernel: cross_attention_encoder_layer.2
= control target key start
LH: loop header
LB: loop body
LE: loop exit
PB: predicated region body
PF: predicated region fallthrough
CT: control target
= control target key end

     0   :  { %s1604_s21 = smov 0   ;;  %s1606_s22 = smov 0   ;;  %s1826_s0 = inlined_call_operand.vmem [shape: f32[2,8,32], index: 0, kind: input, shape index: {}]   ;;  %s1827_s1 = inlined_call_operand.vmem [shape: f32[2,8,32], index: 1, kind: input, shape index: {}]   ;;  %s1828_s2 = inlined_call_operand.vmem [shape: bf16[32,32], index: 2, kind: input, shape index: {}]   ;;  %s1829_s3 = inlined_call_operand.vmem [shape: f32[1,32], index: 3, kind: input, shape index: {}]   ;;  %s1830_s4 = inlined_call_operand.vmem [shape: bf16[32,32], index: 4, kind: input, shape index: {}]   ;;  %s1831_s5 = inlined_call_operand.vmem [shape: f32[1,32], index: 5, kind: input, shape index: {}]   ;;  %s1832_s6 = inlined_call_operand.vmem [shape: bf16[32,32], index: 6, kind: input, shape index: {}]   ;;  %s1833_s7 = inlined_call_operand.vmem [shape: f32[1,32], index: 7, kind: input, shape index: {}]   ;;  %s1834_s8 = inlined_call_operand.vmem [shape: bf16[32,32], index: 8, kind: input, shape index: {}]   ;;  %s1835_s9 = inlined_call_operand.vmem [shape: f32[1,32], index: 9, kind: input, shape index: {}]   ;;  %s1836_s10 = inlined_call_operand.vmem [shape: f32[1,32], index: 10, kind: input, shape index: {}]   ;;  %s1837_s11 = inlined_call_operand.vmem [shape: f32[1,32], index: 11, kind: input, shape index: {}]   ;;  %s1838_s12 = inlined_call_operand.vmem [shape: f32[2,8,32], index: 12, kind: output, shape index: {}]  }
   0x1   :  { %s1608_s23 = smov 0  }
   0x2 LB: > { %s34_s24 = sadd.s32 1, %s1531_s22  ;;  %p1309_p0 = scmp.ge.s32.totalorder %s1535_s23, 1  ;;  %s1535_s23 = sphi %s1608_s23, %s22_s23   ;;  %s1531_s22 = sphi %s1606_s22, %s1848_s22   ;;  %s1527_s21 = sphi %s1604_s21, %s1847_s21  }
   0x3   : > { %p36_p1 = scmp.ge.s32.totalorder %s34_s24, 2  ;;  %p389_p2 = scmp.lt.s32.totalorder %s1535_s23, 3 }
   0x5   : > { %s1850_s24 = smov (%p36_p1, %s34_s24), 0  ;;  %p390_p3 = pnand %p1309_p0, %p389_p2 }
   0x6   : > { %v1487_v0 = vld [vmem:[%s1830_s4] sm:$0xff] (!%p390_p3)   ;;  %v1537_v1 = vmov (!%p390_p3), 0.0   ;;  %v1488_v2 = vld [vmem:[%s1830_s4 + $0x8] sm:$0xff] (!%p390_p3)   ;;  %vm1538_vm0 = vmmov (!%p390_p3), 0   ;;  %p439_p4 = scmp.lt.s32.totalorder (!%p390_p3), %s1527_s21, 1  ;;  %vm487_vm1 = vcmask (!%p390_p3), 261120   ;;  %v671_v15 = vlaneseq (!%p390_p3) }
   0x7   : > { %393 = sbr.rel (%p390_p3) target bundleno = 1562 (0x61a), region = 68  ;;  %1369 = vmatprep.subr.bf16.mxu0 (!%p390_p3), %v1537_v1  ;;  %1377 = vmatprep.subr.bf16.mxu1 (!%p390_p3), %v1537_v1  ;;  %v1489_v4 = vld [vmem:[%s1828_s2] sm:$0xff] (!%p390_p3)   ;;  %v1490_v7 = vld [vmem:[%s1828_s2 + $0x8] sm:$0xff] (!%p390_p3)   ;;  %vm595_vm2 = vcmask (!%p390_p3), 257024  }
   0x8   : > { %1370 = vmatpush3.bf16.msra.mxu0 (!%p390_p3), %v1487_v0  ;;  %1373 = vmatprep.mubr.msk.bf16.mxu0 (!%p390_p3), %vm1538_vm0, %v1537_v1  ;;  %v1491_v9 = vld [vmem:[%s1832_s6] sm:$0xff] (!%p390_p3)   ;;  %v1492_v10 = vld [vmem:[%s1832_s6 + $0x8] sm:$0xff] (!%p390_p3)   ;;  %v672_v19 = vand.u32 (!%p390_p3), 127, %v671_v15 }
   0x9   : > { %1371 = vmatprep.subr.bf16.mxu0 (!%p390_p3), %v1537_v1  ;;  %1381 = vmatprep.mubr.msk.bf16.mxu1 (!%p390_p3), %vm1538_vm0, %v1537_v1  ;;  %v1313_v11 = vld [vmem:[%s1831_s5] ss:$0 sm:$0xff] (!%p390_p3) }
   0xa   : > { %1378 = vmatpush3.bf16.msra.mxu1 (!%p390_p3), %v1491_v9  ;;  %v1321_v20 = vld [vmem:[%s1829_s3] ss:$0 sm:$0xff] (!%p390_p3)  ;;  %vm741_vm3 = vcmp.ge.s32.totalorder (!%p390_p3), %v672_v19, 8  ;;  %vm742_vm4 = vcmp.lt.s32.totalorder (!%p390_p3), %v672_v19, 16  ;;  %vm674_vm5 = vcmp.lt.s32.totalorder (!%p390_p3), %v672_v19, 8  ;;  %vm898_vm9 = vcmp.ge.s32.totalorder (!%p390_p3), %v672_v19, 16 }
   0xb   : > { %1379 = vmatprep.subr.bf16.mxu1 (!%p390_p3), %v1537_v1  ;;  %vm1682_vm6 = vmand (!%p390_p3), %vm741_vm3, %vm742_vm4  ;;  %vm899_vm10 = vcmp.lt.s32.totalorder (!%p390_p3), %v672_v19, 24  ;;  %vm1009_vm13 = vcmp.ge.s32.totalorder (!%p390_p3), %v672_v19, 24  ;;  %vm1010_vm14 = vcmp.lt.s32.totalorder (!%p390_p3), %v672_v19, 32  ;;  %v1317_v37 = vld [vmem:[%s1833_s7] ss:$0 sm:$0xff] (!%p390_p3)  ;;  %vm808_vm4 = vcmask (!%p390_p3), 1043456  }
   0xc   : > { %1372 = vmatpush3.bf16.msra.mxu0 (!%p390_p3), %v1488_v2  ;;  %vm1687_vm7 = vmpackc.low (!%p390_p3), %vm674_vm5, %vm674_vm5  ;;  %v1493_v35 = vld [vmem:[%s1834_s8] sm:$0xff] (!%p390_p3)  }
   0xd   : > { %1385 = vmatprep.subr.bf16.mxu0 (!%p390_p3), %v1537_v1  ;;  %vm746_vm8 = vmpackc.low (!%p390_p3), %vm1682_vm6, %vm1682_vm6 }
   0xe   : > { %s1852_s21 = smov (!%p439_p4, %s1527_s21), 1  ;;  %1380 = vmatpush3.bf16.msra.mxu1 %v1492_v10  ;;  %vm1707_vm11 = vmand %vm898_vm9, %vm899_vm10 }
   0xf   : > { %s1635_s29 = sshll.u32 %s1852_s21, 3  ;;  %1393 = vmatprep.subr.bf16.mxu1 %v1537_v1  ;;  %vm903_vm12 = vmpackc.low %vm1707_vm11, %vm1707_vm11 }
  0x10   : > { %s449_s14 = scalar_lea.vmem %s1827_s1, %s1635_s29  ;;  %s445_s19 = scalar_lea.vmem %s1826_s0, %s1635_s29  ;;  %vm1725_vm15 = vmand %vm1009_vm13, %vm1010_vm14 }
  0x11   : > { %v462_v3 = vld [vmem:[%s449_s14] sm:$0xff]  ;;  %vm1014_vm3 = vmpackc.low %vm1725_vm15, %vm1725_vm15  ;;  %s456_s16 = scalar_lea.vmem %s1838_s12, %s1635_s29 }
  0x12   : > { %v463_v5 = vpack.c.bf16 %v462_v3, %v462_v3  ;;  %v1650_v6 = vld [vmem:[%s445_s19] sm:$0xff] }
  0x13   : > { %v600_v8 = vpack.c.bf16 %v1650_v6, %v1650_v6 }
  0x14   : > { %1374 = vmatmul.mubr.msk.bf16.vlgmr.msra.gmra.mrb[0].mxu0 %vm487_vm1, %v463_v5  ;;  %1382 = vmatmul.mubr.msk.bf16.vlgmr.msra.gmra.mrb[0].mxu1 %vm487_vm1, %v463_v5 }
  0x15   : > { %1386 = vmatpush3.bf16.msra.mxu0 %v1489_v4  ;;  %1389 = vmatprep.mubr.msk.bf16.mxu0 %vm1538_vm0, %v1537_v1 }
  0x16   : > { %1387 = vmatprep.subr.bf16.mxu0 %v1537_v1  ;;  %1395 = vmatprep.mubr.msk.bf16.mxu1 %vm1538_vm0, %v1537_v1 }
  0x19   : > { %1388 = vmatpush3.bf16.msra.mxu0 %v1490_v7 }
  0x1a   : > { %1399 = vmatprep.subr.bf16.mxu0 %v1537_v1 }
  0x1c   : > { %1390 = vmatmul.mubr.msk.bf16.vlgmr.msra.gmra.mrb[4].mxu0 %vm487_vm1, %v600_v8 }
  0x1d   : > { %1401 = vmatprep.mubr.msk.bf16.mxu0 %vm1538_vm0, %v1537_v1 }
  0xe7   : > { %v525_v12 = vpop.f32.mrb[0].mxu0  ;;  %v588_v38 = vpop.f32.mrb[0].mxu1 }
  0xe8   : > { %v526_v13 = vadd.f32 %v1313_v11, %v525_v12  ;;  %v1375_v14 = vpop.f32.mrb[1].mxu0  ;;  %v589_v39 = vadd.f32 %v1317_v37, %v588_v38  ;;  %v1383_v40 = vpop.f32.mrb[1].mxu1 }
  0xe9   : > { %v528_v16 = vpop.f32.mrb[2].mxu0  ;;  %v591_v41 = vpop.f32.mrb[2].mxu1 }
  0xea   : > { %v594_v17 = vpack.c.bf16 %v526_v13, %v526_v13  ;;  %v1376_v18 = vpop.f32.mrb[3].mxu0  ;;  %v597_v42 = vpack.c.bf16 %v589_v39, %v589_v39  ;;  %v1384_v43 = vpop.f32.mrb[3].mxu1 }
  0xec   : > { %596 = vst.msk [vmem:[#allocation2] sm:$0xf] %vm595_vm2, %v594_v17  ;;  %598 = vst.msk [vmem:[#allocation3] sm:$0xf] %vm595_vm2, %v597_v42  ;;  %vm727_vm2 = vcmask 64512  }
  0xef   : > { %v662_v21 = vpop.f32.mrb[4].mxu0 }
  0xf0   : > { %v1391_v22 = vpop.f32.mrb[5].mxu0  ;;  %v663_v23 = vadd.f32 %v1321_v20, %v662_v21 }
  0xf1   : > { %v665_v24 = vpop.f32.mrb[6].mxu0 }
  0xf2   : > { %v1392_v25 = vpop.f32.mrb[7].mxu0  ;;  %v668_v29 = vpack.c.bf16 %v663_v23, %v663_v23 }
  0xf3   : > { %v669_v26 = vld [vmem:[#allocation2] sm:$0xf]  ;;  %v670_v44 = vld [vmem:[#allocation3] sm:$0xf] }
  0xf4   : > { %v684_v28 = vsel %vm487_vm1, %v669_v26, 0  ;;  %v679_v31 = vsel %vm1687_vm7, %v668_v29, 0  ;;  %v747_v32 = vsel %vm746_vm8, %v668_v29, 0  ;;  %v904_v34 = vsel %vm903_vm12, %v668_v29, 0 }
  0xf5   : > { %1394 = vmatpush3.bf16.xpose.msra.mxu1 %v684_v28  ;;  %1400 = vmatpush3.bf16.xpose.msra.mxu0 %v684_v28  ;;  %v1015_v36 = vsel %vm1014_vm3, %v668_v29, 0  ;;  %v803_v45 = vsel %vm746_vm8, %v670_v44, 0  ;;  %v739_v46 = vsel %vm1687_vm7, %v670_v44, 0  ;;  %v960_v49 = vsel %vm903_vm12, %v670_v44, 0 }
  0xf6   : > { %1417 = vmatprep.subr.bf16.mxu0 %v1537_v1  ;;  %1405 = vmatprep.subr.bf16.mxu1 %v1537_v1  ;;  %v810_v47 = vsel %vm808_vm4, %v803_v45, 0  ;;  %v1752_v48 = vsel %vm808_vm4, %v739_v46, 0  ;;  %v1071_v50 = vsel %vm1014_vm3, %v670_v44, 0  ;;  %v1764_v51 = vsel %vm808_vm4, %v960_v49, 0 }
  0xf7   : > { %v1766_v52 = vsel %vm808_vm4, %v1071_v50, 0 }
  0xfc   : > { %1396 = vmatmul.mubr.msk.bf16.vlgmr.msra.gmra.mrb[4].mxu1 %vm487_vm1, %v679_v31  ;;  %1402 = vmatmul.mubr.msk.bf16.vlgmr.msra.gmra.mrb[8].mxu0 %vm487_vm1, %v747_v32 }
  0xfd   : > { %1418 = vmatpush3.bf16.xpose.msra.mxu0 %v684_v28  ;;  %1419 = vmatprep.mubr.msk.bf16.mxu0 %vm1538_vm0, %v1537_v1 }
  0xfe   : > { %1429 = vmatprep.subr.bf16.mxu0 %v1537_v1  ;;  %1407 = vmatprep.mubr.msk.bf16.mxu1 %vm1538_vm0, %v1537_v1 }
  0xff   : > { %1406 = vmatpush3.bf16.msra.mxu1 %v810_v47 }
 0x100   : > { %1411 = vmatprep.subr.bf16.mxu1 %v1537_v1 }
 0x104   : > { %1420 = vmatmul.mubr.msk.bf16.vlgmr.msra.gmra.mrb[12].mxu0 %vm487_vm1, %v904_v34 }
 0x105   : > { %1430 = vmatpush3.bf16.xpose.msra.mxu0 %v684_v28  ;;  %1431 = vmatprep.mubr.msk.bf16.mxu0 %vm1538_vm0, %v1537_v1 }
 0x106   : > { %1441 = vmatprep.subr.bf16.mxu0 %v1537_v1 }
 0x10c   : > { %1432 = vmatmul.mubr.msk.bf16.vlgmr.msra.gmra.mrb[16].mxu0 %vm487_vm1, %v1015_v36 }
 0x10d   : > { %1445 = vmatprep.mubr.msk.bf16.mxu0 %vm1538_vm0, %v1537_v1  ;;  %1442 = vmatpush3.bf16.msra.mxu0 %v1493_v35 }
 0x10e   : > { %1443 = vmatprep.subr.bf16.mxu0 %v1537_v1 }
 0x1cf   : > { %v720_v53 = vpop.f32.mrb[4].mxu1  ;;  %v785_v54 = vpop.f32.mrb[8].mxu0 }
 0x1d0   : > { %v791_v55 = vmul.f32 0.35355338, %v785_v54  ;;  %v1397_v56 = vpop.f32.mrb[5].mxu1  ;;  %v1403_v57 = vpop.f32.mrb[9].mxu0  ;;  %v726_v60 = vmul.f32 0.35355338, %v720_v53 }
 0x1d1   : > { %v723_v58 = vpop.f32.mrb[6].mxu1  ;;  %v788_v59 = vpop.f32.mrb[10].mxu0  ;;  %v1494_v53 = vld [vmem:[%s1834_s8 + $0x8] sm:$0xff]  }
 0x1d2   : > { %v1398_v61 = vpop.f32.mrb[7].mxu1  ;;  %v1404_v62 = vpop.f32.mrb[11].mxu0  ;;  %v792_v63 = vsel %vm727_vm2, %v791_v55, -inf  ;;  %v728_v0 = vsel %vm727_vm2, %v726_v60, -inf  ;;  %1444 = vmatpush3.bf16.msra.mxu0 %v1494_v53 }
 0x1d3   : > { %793 = vmax.xlane.f32.xlu0 %v792_v63 }
 0x1d7   : > { %729 = vmax.xlane.f32.xlu0 %v728_v0  ;;  %v942_v2 = vpop.f32.mrb[12].mxu0 }
 0x1d8   : > { %v948_v3 = vmul.f32 0.35355338, %v942_v2  ;;  %v1421_v4 = vpop.f32.mrb[13].mxu0 }
 0x1d9   : > { %v945_v5 = vpop.f32.mrb[14].mxu0 }
 0x1da   : > { %v1422_v7 = vpop.f32.mrb[15].mxu0  ;;  %v949_v8 = vsel %vm727_vm2, %v948_v3, -inf }
 0x1db   : > { %950 = vmax.xlane.f32.xlu1 %v949_v8 }
 0x1df   : > { %v1053_v9 = vpop.f32.mrb[16].mxu0 }
 0x1e0   : > { %v1059_v10 = vmul.f32 0.35355338, %v1053_v9  ;;  %v1433_v11 = vpop.f32.mrb[17].mxu0 }
 0x1e1   : > { %v1056_v12 = vpop.f32.mrb[18].mxu0 }
 0x1e2   : > { %v1434_v13 = vpop.f32.mrb[19].mxu0  ;;  %v1060_v14 = vsel %vm727_vm2, %v1059_v10, -inf }
 0x1e3   : > { %1061 = vmax.xlane.f32.xlu1 %v1060_v14  ;;  %v1338_v13 = vld [vmem:[%s1837_s11] ss:$0 sm:$0xff] }
 0x260   : > { %v794_v15 = vpop.xlane.xlu0 %793 }
 0x261   : > { %v795_v16 = vsub.f32 %v791_v55, %v794_v15 }
 0x263   : > { %v796_v17 = vmul.f32 1.442695, %v795_v16 }
 0x264   : > { %v730_v18 = vpop.xlane.xlu0 %729 }
 0x265   : > { %1495 = vpow2.f32 %v796_v17  ;;  %v731_v19 = vsub.f32 %v726_v60, %v730_v18 }
 0x267   : > { %v732_v20 = vmul.f32 1.442695, %v731_v19 }
 0x268   : > { %v951_v21 = vpop.xlane.xlu1 %950 }
 0x269   : > { %1497 = vpow2.f32 %v732_v20  ;;  %v952_v22 = vsub.f32 %v948_v3, %v951_v21 }
 0x26b   : > { %v953_v23 = vmul.f32 1.442695, %v952_v22 }
 0x26d   : > { %1499 = vpow2.f32 %v953_v23 }
 0x26f   : > { %v1496_v24 = vpop.eup %1495 }
 0x270   : > { %v1062_v25 = vpop.xlane.xlu1 %1061  ;;  %v798_v26 = vsel %vm727_vm2, %v1496_v24, 0.0 }
 0x271   : > { %v1063_v27 = vsub.f32 %v1059_v10, %v1062_v25  ;;  %799 = vadd.xlane.f32.xlu0 %v798_v26 }
 0x273   : > { %v1498_v28 = vpop.eup %1497  ;;  %v1064_v29 = vmul.f32 1.442695, %v1063_v27 }
 0x274   : > { %v734_v30 = vsel %vm727_vm2, %v1498_v28, 0.0 }
 0x275   : > { %1501 = vpow2.f32 %v1064_v29  ;;  %735 = vadd.xlane.f32.xlu1 %v734_v30 }
 0x277   : > { %v1500_v31 = vpop.eup %1499 }
 0x278   : > { %v955_v32 = vsel %vm727_vm2, %v1500_v31, 0.0 }
 0x279   : > { %956 = vadd.xlane.f32.xlu0 %v955_v32 }
 0x27f   : > { %v1502_v33 = vpop.eup %1501 }
 0x280   : > { %v1066_v34 = vsel %vm727_vm2, %v1502_v33, 0.0 }
 0x281   : > { %1067 = vadd.xlane.f32.xlu1 %v1066_v34 }
 0x2fe   : > { %v800_v36 = vpop.xlane.xlu0 %799 }
 0x2ff   : > { %1503 = vrcp.f32 %v800_v36 }
 0x302   : > { %v736_v37 = vpop.xlane.xlu1 %735 }
 0x303   : > { %1505 = vrcp.f32 %v736_v37 }
 0x306   : > { %v957_v41 = vpop.xlane.xlu0 %956 }
 0x307   : > { %1507 = vrcp.f32 %v957_v41 }
 0x309   : > { %v1504_v38 = vpop.eup %1503 }
 0x30a   : > { %v802_v39 = vmul.f32 %v1504_v38, %v1496_v24 }
 0x30c   : > { %v804_v40 = vpack.c.bf16 %v802_v39, %v802_v39 }
 0x30d   : > { %v1506_v42 = vpop.eup %1505 }
 0x30e   : > { %1408 = vmatmul.mubr.msk.bf16.vlgmr.msra.gmra.mrb[8].mxu1 %vm727_vm2, %v804_v40  ;;  %v738_v43 = vmul.f32 %v1506_v42, %v1498_v28  ;;  %v1068_v45 = vpop.xlane.xlu1 %1067 }
 0x30f   : > { %1412 = vmatpush3.bf16.msra.mxu1 %v1752_v48  ;;  %1413 = vmatprep.mubr.msk.bf16.mxu1 %vm1538_vm0, %v1537_v1  ;;  %1509 = vrcp.f32 %v1068_v45 }
 0x310   : > { %1423 = vmatprep.subr.bf16.mxu1 %v1537_v1  ;;  %v740_v44 = vpack.c.bf16 %v738_v43, %v738_v43 }
 0x311   : > { %v1508_v46 = vpop.eup %1507 }
 0x312   : > { %v959_v47 = vmul.f32 %v1508_v46, %v1500_v31 }
 0x314   : > { %v961_v48 = vpack.c.bf16 %v959_v47, %v959_v47 }
 0x319   : > { %v1510_v49 = vpop.eup %1509 }
 0x31a   : > { %1414 = vmatmul.mubr.msk.bf16.vlgmr.msra.gmra.mrb[8].mxu1 %vm727_vm2, %v740_v44  ;;  %v1070_v50 = vmul.f32 %v1510_v49, %v1502_v33 }
 0x31b   : > { %1424 = vmatpush3.bf16.msra.mxu1 %v1764_v51  ;;  %1425 = vmatprep.mubr.msk.bf16.mxu1 %vm1538_vm0, %v1537_v1 }
 0x31c   : > { %1435 = vmatprep.subr.bf16.mxu1 %v1537_v1  ;;  %v1072_v51 = vpack.c.bf16 %v1070_v50, %v1070_v50 }
 0x326   : > { %1426 = vmatmul.mubr.msk.bf16.vlgmr.msra.gmra.mrb[8].mxu1 %vm727_vm2, %v961_v48 }
 0x327   : > { %1436 = vmatpush3.bf16.msra.mxu1 %v1766_v52  ;;  %1437 = vmatprep.mubr.msk.bf16.mxu1 %vm1538_vm0, %v1537_v1  ;;  %v1333_v1 = vld [vmem:[%s1835_s9] ss:$0 sm:$0xff] }
 0x332   : > { %1438 = vmatmul.mubr.msk.bf16.vlgmr.msra.gmra.mrb[8].mxu1 %vm727_vm2, %v1072_v51 }
 0x405   : > { %v1113_v54 = vpop.f32.mrb[8].mxu1 }
 0x406   : > { %v1120_v55 = vpack.c.bf16 %v1113_v54, %v1113_v54  ;;  %v1439_v56 = vpop.f32.mrb[9].mxu1 }
 0x407   : > { %v1116_v57 = vpop.f32.mrb[10].mxu1 }
 0x408   : > { %v1440_v58 = vpop.f32.mrb[11].mxu1  ;;  %1446 = vmatmul.mubr.msk.bf16.vlgmr.msra.gmra.mrb[20].mxu0 %vm487_vm1, %v1120_v55 }
 0x4db   : > { %v1181_v52 = vpop.f32.mrb[20].mxu0 }
 0x4dc   : > { %v1182_v59 = vadd.f32 %v1333_v1, %v1181_v52  ;;  %v1447_v60 = vpop.f32.mrb[21].mxu0 }
 0x4dd   : > { %v1184_v61 = vpop.f32.mrb[22].mxu0 }
 0x4de   : > { %v1448_v62 = vpop.f32.mrb[23].mxu0  ;;  %v1187_v63 = vadd.f32 %v1182_v59, %v1650_v6  ;;  %v1337_v6 = vld [vmem:[%s1836_s10] ss:$0 sm:$0xff] }
 0x4e0   : > { %v1188_v0 = vsel %vm487_vm1, %v1187_v63, 0.0 }
 0x4e1   : > { %1189 = vadd.xlane.f32.xlu0 %v1188_v0 }
 0x56e   : > { %v1190_v2 = vpop.xlane.xlu0 %1189 }
 0x56f   : > { %v1192_v3 = vmul.f32 0.03125, %v1190_v2 }
 0x571   : > { %v1193_v4 = vsub.f32 %v1187_v63, %v1192_v3 }
 0x573   : > { %v1194_v5 = vmul.f32 %v1193_v4, %v1193_v4 }
 0x575   : > { %v1195_v7 = vsel %vm487_vm1, %v1194_v5, 0.0 }
 0x576   : > { %1196 = vadd.xlane.f32.xlu1 %v1195_v7 }
 0x603   : > { %v1197_v8 = vpop.xlane.xlu1 %1196 }
 0x604   : > { %v1198_v9 = vmul.f32 0.03125, %v1197_v8 }
 0x606   : > { %v1199_v10 = vadd.f32 1e-05, %v1198_v9 }
 0x608   : > { %1511 = vrsqrt.f32 %v1199_v10 }
 0x612   : > { %v1512_v11 = vpop.eup %1511 }
 0x613   : > { %v1201_v12 = vmul.f32 %v1512_v11, %v1193_v4 }
 0x615   : > { %v1209_v14 = vmul.f32 %v1337_v6, %v1201_v12 }
 0x617   : > { %v1217_v15 = vadd.f32 %v1338_v13, %v1209_v14 }
 0x619   : > { %1218 = vst.msk [vmem:[%s456_s16] sm:$0xff] %vm487_vm1, %v1217_v15 }
 0x61a PF: > { %s22_s23 = sadd.s32 1, %s1535_s23   ;;  %s1847_s21 = smov %s1531_s22 }
 0x61b   : > { %p19_p5 = scmp.ge.s32.totalorder %s22_s23, 4   ;;  %s1848_s22 = smov %s1850_s24 }
 0x61d   :  { %21 = sbr.rel (!%p19_p5) target bundleno = 2 (0x2), region = 105 }

</bundles_post_ra>
